<compile_context>
chip_gen: v5e
topology: v5e:2x2
jax: 0.10.0
libtpu: 0.0.40
codegen_flags: <defaults>
</compile_context>

<pallas_src>
import jax
import jax.numpy as jnp
from jax.experimental import pallas as pl
from jax.experimental.pallas import tpu as pltpu


# ----------------------------- configuration --------------------------------
B = 2                 # batch
SEQ = 8               # char sequence length (encoder input)
VOCAB = 127           # => output projection width = VOCAB + 1 = 128
LATENT_VOCAB = 128
CHAR_DIM = 32
DIM = 128             # transformer / decoder embedding dim
SHRINK = 2
DEC_LAYERS = 2
WINDOW = 3
MAX_LEN = 64
TAU = 2.0

L_LAT = SEQ // SHRINK               # latent sequence length   (4)
T_OUT = L_LAT * 2 * SHRINK          # decoder sequence length  (16)
OUT_V = VOCAB + 1                   # 128
N_ROWS = B * T_OUT                  # flattened decoder rows   (32)
N_LAT = B * L_LAT                   # flattened latent rows    (8)

# fslab (f32, (48, 128)) row layout -------------------------------------------
_ADD = 0                            # rows [0, N_ROWS): tiled pos + latent-emb bias
_BP = N_ROWS                        # 32: latent_projection bias
_LN0G = _BP + 1                     # 33: pre_deconv LN gamma
_LN0B = _BP + 2                     # 34: pre_deconv LN beta
_CONV0 = _BP + 3                    # 35: per-layer 4-row block (bias_a, bias_g, ln_g, ln_b)
_LNOG = _CONV0 + 4 * DEC_LAYERS     # 43: output LN gamma
_LNOB = _LNOG + 1                   # 44: output LN beta
_BO = _LNOG + 2                     # 45: output Linear bias
FSLAB_ROWS = _BO + 1                # 46
FSLAB_PAD = 48                      # padded sublane count

# wslab (bf16, (128, 768)) lane layout:  [0:128)=wp  [128:256)=wo  [256:768)=we


# ------------------------------ Pallas kernel --------------------------------
def _layernorm(x, gamma, beta, eps=1e-5):
    mu = jnp.mean(x, axis=-1, keepdims=True)
    var = jnp.mean((x - mu) ** 2, axis=-1, keepdims=True)
    return (x - mu) * jax.lax.rsqrt(var + eps) * gamma + beta


def autoencoder_kernel(
    enc_ref,        # (N_LAT, DIM)            f32
    gum_ref,        # (N_LAT, LATENT_VOCAB)   f32
    wslab_ref,      # (DIM, 6*DIM)            bf16   [wp | wo | we]
    convw_ref,      # (LAYERS, WINDOW*DIM, 2*DIM) bf16
    fslab_ref,      # (FSLAB_PAD, DIM)        f32
    out_ref,        # (N_ROWS, OUT_V)         f32
):
    f32 = jnp.float32
    bf16 = jnp.bfloat16

    # Static, 128-aligned lane slices of the packed bf16 weight slab.
    wp = wslab_ref[:, 0:DIM]                  # (DIM, LATENT_VOCAB)
    wo = wslab_ref[:, DIM:2 * DIM]            # (DIM, OUT_V)
    we = wslab_ref[:, 2 * DIM:]               # (LATENT_VOCAB, 2*SHRINK*DIM)

    # ---- AutoEncoder.latent_projection (bf16 MXU operands, f32 accumulate) --
    latent_logits = (
        jnp.dot(enc_ref[...].astype(bf16), wp, preferred_element_type=f32)
        + fslab_ref[_BP:_BP + 1, :]
    )                                                       # (N_LAT, LV) f32

    # ---- gumbel_softmax (soft, tau=TEMPERATURE, dim=-1), exact f32 math ----
    z = (latent_logits + gum_ref[...]) * (1.0 / TAU)
    z = z - jnp.max(z, axis=-1, keepdims=True)
    e = jnp.exp(z)
    latent_words = e / jnp.sum(e, axis=-1, keepdims=True)

    # ---- ConvDecoder.latent_embedding -> flattened (N_ROWS, DIM) slab ----
    # Bias of this Linear is pre-folded into fslab rows [0, N_ROWS) (with pos).
    emb = jnp.dot(latent_words.astype(bf16), we,
                  preferred_element_type=f32)               # (N_LAT, 2*SHRINK*DIM)
    # Lane->sublane split-merge reshape (tiny: 4 vregs); proven lowering kept.
    x = emb.reshape(N_ROWS, DIM)

    # ---- + (pre-tiled position embeddings + latent-emb bias), pre_deconv LN -
    x = x + fslab_ref[0:N_ROWS, :]
    x = _layernorm(x, fslab_ref[_LN0G:_LN0G + 1, :], fslab_ref[_LN0B:_LN0B + 1, :])

    # Row-validity masks: a rolled neighbour row is zeroed when it belongs to a
    # different batch element (or wraps) -> emulates per-sequence Conv1d zero
    # padding inside the flattened (B*T_OUT) slab.  T_OUT is a power of two.
    row = jax.lax.broadcasted_iota(jnp.int32, (N_ROWS, 1), 0)
    t = row & (T_OUT - 1)
    left_ok = (t != 0).astype(f32)              # t == 0       -> pad
    right_ok = (t != T_OUT - 1).astype(f32)     # t == T_OUT-1 -> pad

    # ---- static conv stack: Conv1d(D -> 2D, k=WINDOW, pad=WINDOW//2) + GLU
    #      + residual + LayerNorm (Dropout = identity).
    #      One K = WINDOW*DIM matmul per layer (im2col along lanes via roll).
    for i in range(DEC_LAYERS):
        base = _CONV0 + 4 * i
        left = pltpu.roll(x, shift=1, axis=0) * left_ok             # x[t-1]
        right = pltpu.roll(x, shift=N_ROWS - 1, axis=0) * right_ok  # x[t+1]
        xcol = jnp.concatenate([left, x, right], axis=-1).astype(bf16)  # (N, 3*DIM)
        acc = jnp.dot(xcol, convw_ref[i], preferred_element_type=f32)   # (N, 2*DIM)
        a = acc[:, :DIM] + fslab_ref[base:base + 1, :]       # conv bias, a-half
        g = acc[:, DIM:] + fslab_ref[base + 1:base + 2, :]   # conv bias, gate-half
        glu = a * jax.nn.sigmoid(g)
        x = _layernorm(glu + x,
                       fslab_ref[base + 2:base + 3, :],
                       fslab_ref[base + 3:base + 4, :])

    # ---- output_proj: LayerNorm + Linear(DIM, VOCAB + 1) ----
    x = _layernorm(x, fslab_ref[_LNOG:_LNOG + 1, :], fslab_ref[_LNOB:_LNOB + 1, :])
    logits = (
        jnp.dot(x.astype(bf16), wo, preferred_element_type=f32)
        + fslab_ref[_BO:_BO + 1, :]
    )
    out_ref[...] = logits.astype(out_ref.dtype)


def autoencoder_forward(encoded, gumbel, params):
    """Latent projection + gumbel softmax + ConvDecoder in ONE Pallas call.

    Gridless single step: the whole working set is < 1 MiB of VMEM, so there is
    nothing to pipeline; weights are DMA'd exactly once and every matmul sees
    the full (B*T_OUT, .) lane-dense slab.
    """
    p = params
    enc_flat = encoded.reshape(N_LAT, DIM).astype(jnp.float32)
    gum_flat = gumbel.reshape(N_LAT, LATENT_VOCAB).astype(jnp.float32)

    vmem_spec = pl.BlockSpec(memory_space=pltpu.MemorySpace.VMEM)
    logits_flat = pl.pallas_call(
        autoencoder_kernel,
        out_shape=jax.ShapeDtypeStruct((N_ROWS, OUT_V), jnp.float32),
        in_specs=[vmem_spec] * 5,
        out_specs=vmem_spec,
        cost_estimate=pl.CostEstimate(
            flops=15_000_000,            # 4 MXU matmuls on the (8|32, .) slabs
            transcendentals=10_000,      # softmax exp + GLU sigmoids + rsqrts
            bytes_accessed=650_000,      # ~590 KB bf16 weights + acts/consts
        ),
    )(enc_flat, gum_flat, p["wslab"], p["conv_w"], p["fslab"])
    return logits_flat.reshape(B, T_OUT, OUT_V)


autoencoder_forward = jax.jit(autoencoder_forward)


# ------------------------------ parameter init --------------------------------
def init_params(key):
    ks = jax.random.split(key, 8)

    def n(k, shape, dtype=jnp.float32, s=0.02):
        return (s * jax.random.normal(k, shape)).astype(dtype)

    p = {}
    # stub encoder (plain-JAX glue)
    p["char_table"] = n(ks[0], (VOCAB, CHAR_DIM))
    p["enc_w"] = n(ks[1], (SHRINK * CHAR_DIM, DIM))
    p["enc_b"] = jnp.zeros((DIM,), jnp.float32)

    # ---- raw decoder parameters (PyTorch-equivalent shapes) ----
    wp = n(ks[2], (DIM, LATENT_VOCAB), jnp.bfloat16)          # latent_projection.W^T
    bp = jnp.zeros((LATENT_VOCAB,), jnp.float32)
    we = n(ks[3], (LATENT_VOCAB, 2 * SHRINK * DIM), jnp.bfloat16)  # latent_embedding.W^T
    be = jnp.zeros((2 * SHRINK * DIM,), jnp.float32)
    pos = jax.random.normal(ks[4], (1, MAX_LEN, DIM)).astype(jnp.float32)
    ln0_g = jnp.ones((DIM,), jnp.float32)
    ln0_b = jnp.zeros((DIM,), jnp.float32)
    # conv stack, weights pre-stacked for the K=WINDOW*DIM matmul.
    # To import real PyTorch Conv1d weights of shape (2*DIM, DIM, WINDOW):
    #   conv_w[layer] = torch_w.permute(2, 1, 0).reshape(WINDOW * DIM, 2 * DIM)
    conv_w = n(ks[5], (DEC_LAYERS, WINDOW * DIM, 2 * DIM), jnp.bfloat16)
    conv_b = jnp.zeros((DEC_LAYERS, 2 * DIM), jnp.float32)
    cnn_g = jnp.ones((DEC_LAYERS, DIM), jnp.float32)
    cnn_b = jnp.zeros((DEC_LAYERS, DIM), jnp.float32)
    lno_g = jnp.ones((DIM,), jnp.float32)
    lno_b = jnp.zeros((DIM,), jnp.float32)
    wo = n(ks[6], (DIM, OUT_V), jnp.bfloat16)                 # output_proj Linear.W^T
    bo = jnp.zeros((OUT_V,), jnp.float32)

    # ---- one-time packing into the 3 kernel slabs ----
    # bf16 weight slab: [wp | wo | we] share the same 128-row (DIM == LV) axis.
    p["wslab"] = jnp.concatenate([wp, wo, we], axis=1)        # (128, 768) bf16
    p["conv_w"] = conv_w                                      # (2, 384, 256) bf16

    # f32 const slab: tiled positions + folded latent-embedding bias, then all
    # the small bias / LayerNorm vectors, one 128-wide row each.
    pos_t = jnp.tile(pos[0, :T_OUT, :], (B, 1))               # row r -> pos[r % 16]
    be_t = jnp.tile(be.reshape(2 * SHRINK, DIM), (N_LAT, 1))  # row r -> be[r % 4]
    rows = [pos_t + be_t,                                     # rows [0, 32)
            bp[None, :], ln0_g[None, :], ln0_b[None, :]]      # 32, 33, 34
    for i in range(DEC_LAYERS):                               # 35..42
        rows += [conv_b[i, :DIM][None, :], conv_b[i, DIM:][None, :],
                 cnn_g[i][None, :], cnn_b[i][None, :]]
    rows += [lno_g[None, :], lno_b[None, :], bo[None, :]]     # 43, 44, 45
    fslab = jnp.concatenate(rows, axis=0)
    assert fslab.shape[0] == FSLAB_ROWS
    fslab = jnp.concatenate(
        [fslab, jnp.zeros((FSLAB_PAD - FSLAB_ROWS, DIM), jnp.float32)], axis=0)
    p["fslab"] = fslab                                        # (48, 128) f32
    return p


# TODO(synk): Encoder / PerceiverEncoder source was not provided; this is a
# deterministic plain-JAX stub that only reproduces the interface
# (encoded: (B, L_LAT, DIM), latent_mask: (B, L_LAT)).
def stub_encoder(data, mask, p):
    emb = p["char_table"][data] * mask[..., None]                 # (B, SEQ, CHAR_DIM)
    grouped = emb.reshape(B, L_LAT, SHRINK * CHAR_DIM)
    encoded = grouped @ p["enc_w"] + p["enc_b"]                   # (B, L_LAT, DIM)
    latent_mask = mask.reshape(B, L_LAT, SHRINK).max(axis=-1)     # (B, L_LAT)
    return encoded, latent_mask


if __name__ == "__main__":
    key = jax.random.PRNGKey(0)
    k_param, k_data, k_gum = jax.random.split(key, 3)

    params = init_params(k_param)

    data = jax.random.randint(k_data, (B, SEQ), 0, VOCAB, dtype=jnp.int32)
    mask = jnp.ones((B, SEQ), jnp.float32)

    # Encoder (stub, plain JAX)
    encoded, latent_mask = stub_encoder(data, mask, params)

    # Gumbel noise for gumbel_softmax (inference=False, hard=False path)
    gumbel = jax.random.gumbel(k_gum, (B, L_LAT, LATENT_VOCAB)).astype(jnp.float32)

    # Fused Pallas kernel: latent projection -> gumbel softmax -> ConvDecoder
    logits = autoencoder_forward(encoded, gumbel, params)

    # output_mask = mask.unsqueeze(2).repeat(1, 1, 2*shrink).reshape(B, -1)
    # (only returned by the reference decoder; it does not affect the logits)
    output_mask = jnp.repeat(latent_mask, 2 * SHRINK, axis=1)

    logits = jax.block_until_ready(logits)
    output_mask = jax.block_until_ready(output_mask)

    assert logits.shape == (B, T_OUT, OUT_V)
    assert output_mask.shape == (B, T_OUT)
    assert bool(jnp.all(jnp.isfinite(logits)))
    print("KERNEL_OK")
</pallas_src>

<mosaic_0001>
module attributes {stable_mosaic.version = 11 : i64} {
  func.func @autoencoder_kernel(%arg0: memref<8x128xf32, #tpu.memory_space<vmem>>, %arg1: memref<8x128xf32, #tpu.memory_space<vmem>>, %arg2: memref<128x768xbf16, #tpu.memory_space<vmem>>, %arg3: memref<2x384x256xbf16, #tpu.memory_space<vmem>>, %arg4: memref<48x128xf32, #tpu.memory_space<vmem>>, %arg5: memref<32x128xf32, #tpu.memory_space<vmem>>) attributes {dimension_semantics = [], scalar_prefetch = 0 : i64, scratch_operands = 0 : i64, tpu.core_type = #tpu.core_type<tc>} {
    %c0 = arith.constant 0 : index
    %c0_0 = arith.constant 0 : index
    %0 = vector.load %arg2[%c0, %c0_0] : memref<128x768xbf16, #tpu.memory_space<vmem>>, vector<128x128xbf16>
    %c0_1 = arith.constant 0 : index
    %c128 = arith.constant 128 : index
    %1 = vector.load %arg2[%c0_1, %c128] : memref<128x768xbf16, #tpu.memory_space<vmem>>, vector<128x128xbf16>
    %c0_2 = arith.constant 0 : index
    %c256 = arith.constant 256 : index
    %2 = vector.load %arg2[%c0_2, %c256] : memref<128x768xbf16, #tpu.memory_space<vmem>>, vector<128x512xbf16>
    %c0_3 = arith.constant 0 : index
    %c0_4 = arith.constant 0 : index
    %3 = vector.load %arg0[%c0_3, %c0_4] : memref<8x128xf32, #tpu.memory_space<vmem>>, vector<8x128xf32>
    %4 = arith.truncf %3 : vector<8x128xf32> to vector<8x128xbf16>
    %cst = arith.constant dense<0.000000e+00> : vector<8x128xf32>
    %5 = tpu.matmul %4, %0, %cst {dimension_numbers = #tpu.dot_dimension_numbers<[1], [0], [0], [1], [0, 0, 1, 1], [], []>} : vector<8x128xbf16>, vector<128x128xbf16>, vector<8x128xf32> -> vector<8x128xf32>
    %c32 = arith.constant 32 : index
    %c0_5 = arith.constant 0 : index
    %6 = vector.load %arg4[%c32, %c0_5] : memref<48x128xf32, #tpu.memory_space<vmem>>, vector<1x128xf32>
    %7 = vector.broadcast %6 : vector<1x128xf32> to vector<8x128xf32>
    %8 = arith.addf %5, %7 : vector<8x128xf32>
    %c0_6 = arith.constant 0 : index
    %c0_7 = arith.constant 0 : index
    %9 = vector.load %arg1[%c0_6, %c0_7] : memref<8x128xf32, #tpu.memory_space<vmem>>, vector<8x128xf32>
    %10 = arith.addf %8, %9 : vector<8x128xf32>
    %cst_8 = arith.constant 5.000000e-01 : f32
    %11 = vector.broadcast %cst_8 : f32 to vector<8x128xf32>
    %12 = arith.mulf %10, %11 : vector<8x128xf32>
    %cst_9 = arith.constant dense<0xFF800000> : vector<8xf32>
    %13 = vector.multi_reduction <maximumf>, %12, %cst_9 [1] : vector<8x128xf32> to vector<8xf32>
    %14 = vector.shape_cast %13 : vector<8xf32> to vector<8x1xf32>
    %15 = vector.broadcast %14 : vector<8x1xf32> to vector<8x128xf32>
    %16 = arith.subf %12, %15 : vector<8x128xf32>
    %17 = math.exp %16 : vector<8x128xf32>
    %cst_10 = arith.constant dense<0.000000e+00> : vector<8xf32>
    %18 = vector.multi_reduction <add>, %17, %cst_10 [1] : vector<8x128xf32> to vector<8xf32>
    %19 = vector.shape_cast %18 : vector<8xf32> to vector<8x1xf32>
    %20 = vector.broadcast %19 : vector<8x1xf32> to vector<8x128xf32>
    %21 = arith.divf %17, %20 : vector<8x128xf32>
    %22 = arith.truncf %21 : vector<8x128xf32> to vector<8x128xbf16>
    %cst_11 = arith.constant dense<0.000000e+00> : vector<8x512xf32>
    %23 = tpu.matmul %22, %2, %cst_11 {dimension_numbers = #tpu.dot_dimension_numbers<[1], [0], [0], [1], [0, 0, 1, 1], [], []>} : vector<8x128xbf16>, vector<128x512xbf16>, vector<8x512xf32> -> vector<8x512xf32>
    %24 = vector.shape_cast %23 : vector<8x512xf32> to vector<32x128xf32>
    %c0_12 = arith.constant 0 : index
    %c0_13 = arith.constant 0 : index
    %25 = vector.load %arg4[%c0_12, %c0_13] : memref<48x128xf32, #tpu.memory_space<vmem>>, vector<32x128xf32>
    %26 = arith.addf %24, %25 : vector<32x128xf32>
    %c33 = arith.constant 33 : index
    %c0_14 = arith.constant 0 : index
    %27 = vector.load %arg4[%c33, %c0_14] : memref<48x128xf32, #tpu.memory_space<vmem>>, vector<1x128xf32>
    %c34 = arith.constant 34 : index
    %c0_15 = arith.constant 0 : index
    %28 = vector.load %arg4[%c34, %c0_15] : memref<48x128xf32, #tpu.memory_space<vmem>>, vector<1x128xf32>
    %cst_16 = arith.constant dense<0.000000e+00> : vector<32xf32>
    %29 = vector.multi_reduction <add>, %26, %cst_16 [1] : vector<32x128xf32> to vector<32xf32>
    %30 = vector.shape_cast %29 : vector<32xf32> to vector<32x1xf32>
    %cst_17 = arith.constant 1.280000e+02 : f32
    %31 = vector.broadcast %cst_17 : f32 to vector<32x1xf32>
    %32 = arith.divf %30, %31 : vector<32x1xf32>
    %33 = vector.broadcast %32 : vector<32x1xf32> to vector<32x128xf32>
    %34 = arith.subf %26, %33 : vector<32x128xf32>
    %35 = arith.mulf %34, %34 : vector<32x128xf32>
    %cst_18 = arith.constant dense<0.000000e+00> : vector<32xf32>
    %36 = vector.multi_reduction <add>, %35, %cst_18 [1] : vector<32x128xf32> to vector<32xf32>
    %37 = vector.shape_cast %36 : vector<32xf32> to vector<32x1xf32>
    %cst_19 = arith.constant 1.280000e+02 : f32
    %38 = vector.broadcast %cst_19 : f32 to vector<32x1xf32>
    %39 = arith.divf %37, %38 : vector<32x1xf32>
    %40 = vector.broadcast %32 : vector<32x1xf32> to vector<32x128xf32>
    %41 = arith.subf %26, %40 : vector<32x128xf32>
    %cst_20 = arith.constant 9.99999974E-6 : f32
    %42 = vector.broadcast %cst_20 : f32 to vector<32x1xf32>
    %43 = arith.addf %39, %42 : vector<32x1xf32>
    %44 = math.rsqrt %43 : vector<32x1xf32>
    %45 = vector.broadcast %44 : vector<32x1xf32> to vector<32x128xf32>
    %46 = arith.mulf %41, %45 : vector<32x128xf32>
    %47 = vector.broadcast %27 : vector<1x128xf32> to vector<32x128xf32>
    %48 = arith.mulf %46, %47 : vector<32x128xf32>
    %49 = vector.broadcast %28 : vector<1x128xf32> to vector<32x128xf32>
    %50 = arith.addf %48, %49 : vector<32x128xf32>
    %51 = tpu.iota {dimensions = array<i32: 0>} : vector<32x1xi32>
    %c15_i32 = arith.constant 15 : i32
    %52 = vector.broadcast %c15_i32 : i32 to vector<32x1xi32>
    %53 = arith.andi %51, %52 : vector<32x1xi32>
    %c0_i32 = arith.constant 0 : i32
    %54 = vector.broadcast %c0_i32 : i32 to vector<32x1xi32>
    %55 = arith.cmpi ne, %53, %54 : vector<32x1xi32>
    %56 = arith.extui %55 : vector<32x1xi1> to vector<32x1xi32>
    %57 = arith.sitofp %56 : vector<32x1xi32> to vector<32x1xf32>
    %c15_i32_21 = arith.constant 15 : i32
    %58 = vector.broadcast %c15_i32_21 : i32 to vector<32x1xi32>
    %59 = arith.cmpi ne, %53, %58 : vector<32x1xi32>
    %60 = arith.extui %59 : vector<32x1xi1> to vector<32x1xi32>
    %61 = arith.sitofp %60 : vector<32x1xi32> to vector<32x1xf32>
    %c1_i32 = arith.constant 1 : i32
    %62 = tpu.dynamic_rotate %50 by %c1_i32 dim 0 : vector<32x128xf32>, i32 -> vector<32x128xf32>
    %63 = vector.broadcast %57 : vector<32x1xf32> to vector<32x128xf32>
    %64 = arith.mulf %62, %63 : vector<32x128xf32>
    %c31_i32 = arith.constant 31 : i32
    %65 = tpu.dynamic_rotate %50 by %c31_i32 dim 0 : vector<32x128xf32>, i32 -> vector<32x128xf32>
    %66 = vector.broadcast %61 : vector<32x1xf32> to vector<32x128xf32>
    %67 = arith.mulf %65, %66 : vector<32x128xf32>
    %68 = tpu.concatenate %64, %50, %67 in 1 : vector<32x128xf32>, vector<32x128xf32>, vector<32x128xf32> -> vector<32x384xf32>
    %69 = arith.truncf %68 : vector<32x384xf32> to vector<32x384xbf16>
    %c0_22 = arith.constant 0 : index
    %c0_23 = arith.constant 0 : index
    %c0_24 = arith.constant 0 : index
    %70 = vector.load %arg3[%c0_22, %c0_23, %c0_24] : memref<2x384x256xbf16, #tpu.memory_space<vmem>>, vector<1x384x256xbf16>
    %71 = vector.shape_cast %70 : vector<1x384x256xbf16> to vector<384x256xbf16>
    %cst_25 = arith.constant dense<0.000000e+00> : vector<32x256xf32>
    %72 = tpu.matmul %69, %71, %cst_25 {dimension_numbers = #tpu.dot_dimension_numbers<[1], [0], [0], [1], [0, 0, 1, 1], [], []>} : vector<32x384xbf16>, vector<384x256xbf16>, vector<32x256xf32> -> vector<32x256xf32>
    %73 = vector.extract_strided_slice %72 {offsets = [0, 0], sizes = [32, 128], strides = [1, 1]} : vector<32x256xf32> to vector<32x128xf32>
    %c35 = arith.constant 35 : index
    %c0_26 = arith.constant 0 : index
    %74 = vector.load %arg4[%c35, %c0_26] : memref<48x128xf32, #tpu.memory_space<vmem>>, vector<1x128xf32>
    %75 = vector.broadcast %74 : vector<1x128xf32> to vector<32x128xf32>
    %76 = arith.addf %73, %75 : vector<32x128xf32>
    %77 = vector.extract_strided_slice %72 {offsets = [0, 128], sizes = [32, 128], strides = [1, 1]} : vector<32x256xf32> to vector<32x128xf32>
    %c36 = arith.constant 36 : index
    %c0_27 = arith.constant 0 : index
    %78 = vector.load %arg4[%c36, %c0_27] : memref<48x128xf32, #tpu.memory_space<vmem>>, vector<1x128xf32>
    %79 = vector.broadcast %78 : vector<1x128xf32> to vector<32x128xf32>
    %80 = arith.addf %77, %79 : vector<32x128xf32>
    %81 = arith.negf %80 : vector<32x128xf32>
    %82 = math.exp %81 : vector<32x128xf32>
    %cst_28 = arith.constant 1.000000e+00 : f32
    %83 = vector.broadcast %cst_28 : f32 to vector<32x128xf32>
    %84 = arith.addf %83, %82 : vector<32x128xf32>
    %85 = arith.divf %83, %84 : vector<32x128xf32>
    %86 = arith.mulf %76, %85 : vector<32x128xf32>
    %87 = arith.addf %86, %50 : vector<32x128xf32>
    %c37 = arith.constant 37 : index
    %c0_29 = arith.constant 0 : index
    %88 = vector.load %arg4[%c37, %c0_29] : memref<48x128xf32, #tpu.memory_space<vmem>>, vector<1x128xf32>
    %c38 = arith.constant 38 : index
    %c0_30 = arith.constant 0 : index
    %89 = vector.load %arg4[%c38, %c0_30] : memref<48x128xf32, #tpu.memory_space<vmem>>, vector<1x128xf32>
    %cst_31 = arith.constant dense<0.000000e+00> : vector<32xf32>
    %90 = vector.multi_reduction <add>, %87, %cst_31 [1] : vector<32x128xf32> to vector<32xf32>
    %91 = vector.shape_cast %90 : vector<32xf32> to vector<32x1xf32>
    %cst_32 = arith.constant 1.280000e+02 : f32
    %92 = vector.broadcast %cst_32 : f32 to vector<32x1xf32>
    %93 = arith.divf %91, %92 : vector<32x1xf32>
    %94 = vector.broadcast %93 : vector<32x1xf32> to vector<32x128xf32>
    %95 = arith.subf %87, %94 : vector<32x128xf32>
    %96 = arith.mulf %95, %95 : vector<32x128xf32>
    %cst_33 = arith.constant dense<0.000000e+00> : vector<32xf32>
    %97 = vector.multi_reduction <add>, %96, %cst_33 [1] : vector<32x128xf32> to vector<32xf32>
    %98 = vector.shape_cast %97 : vector<32xf32> to vector<32x1xf32>
    %cst_34 = arith.constant 1.280000e+02 : f32
    %99 = vector.broadcast %cst_34 : f32 to vector<32x1xf32>
    %100 = arith.divf %98, %99 : vector<32x1xf32>
    %101 = vector.broadcast %93 : vector<32x1xf32> to vector<32x128xf32>
    %102 = arith.subf %87, %101 : vector<32x128xf32>
    %cst_35 = arith.constant 9.99999974E-6 : f32
    %103 = vector.broadcast %cst_35 : f32 to vector<32x1xf32>
    %104 = arith.addf %100, %103 : vector<32x1xf32>
    %105 = math.rsqrt %104 : vector<32x1xf32>
    %106 = vector.broadcast %105 : vector<32x1xf32> to vector<32x128xf32>
    %107 = arith.mulf %102, %106 : vector<32x128xf32>
    %108 = vector.broadcast %88 : vector<1x128xf32> to vector<32x128xf32>
    %109 = arith.mulf %107, %108 : vector<32x128xf32>
    %110 = vector.broadcast %89 : vector<1x128xf32> to vector<32x128xf32>
    %111 = arith.addf %109, %110 : vector<32x128xf32>
    %c1_i32_36 = arith.constant 1 : i32
    %112 = tpu.dynamic_rotate %111 by %c1_i32_36 dim 0 : vector<32x128xf32>, i32 -> vector<32x128xf32>
    %113 = vector.broadcast %57 : vector<32x1xf32> to vector<32x128xf32>
    %114 = arith.mulf %112, %113 : vector<32x128xf32>
    %c31_i32_37 = arith.constant 31 : i32
    %115 = tpu.dynamic_rotate %111 by %c31_i32_37 dim 0 : vector<32x128xf32>, i32 -> vector<32x128xf32>
    %116 = vector.broadcast %61 : vector<32x1xf32> to vector<32x128xf32>
    %117 = arith.mulf %115, %116 : vector<32x128xf32>
    %118 = tpu.concatenate %114, %111, %117 in 1 : vector<32x128xf32>, vector<32x128xf32>, vector<32x128xf32> -> vector<32x384xf32>
    %119 = arith.truncf %118 : vector<32x384xf32> to vector<32x384xbf16>
    %c1 = arith.constant 1 : index
    %c0_38 = arith.constant 0 : index
    %c0_39 = arith.constant 0 : index
    %120 = vector.load %arg3[%c1, %c0_38, %c0_39] : memref<2x384x256xbf16, #tpu.memory_space<vmem>>, vector<1x384x256xbf16>
    %121 = vector.shape_cast %120 : vector<1x384x256xbf16> to vector<384x256xbf16>
    %cst_40 = arith.constant dense<0.000000e+00> : vector<32x256xf32>
    %122 = tpu.matmul %119, %121, %cst_40 {dimension_numbers = #tpu.dot_dimension_numbers<[1], [0], [0], [1], [0, 0, 1, 1], [], []>} : vector<32x384xbf16>, vector<384x256xbf16>, vector<32x256xf32> -> vector<32x256xf32>
    %123 = vector.extract_strided_slice %122 {offsets = [0, 0], sizes = [32, 128], strides = [1, 1]} : vector<32x256xf32> to vector<32x128xf32>
    %c39 = arith.constant 39 : index
    %c0_41 = arith.constant 0 : index
    %124 = vector.load %arg4[%c39, %c0_41] : memref<48x128xf32, #tpu.memory_space<vmem>>, vector<1x128xf32>
    %125 = vector.broadcast %124 : vector<1x128xf32> to vector<32x128xf32>
    %126 = arith.addf %123, %125 : vector<32x128xf32>
    %127 = vector.extract_strided_slice %122 {offsets = [0, 128], sizes = [32, 128], strides = [1, 1]} : vector<32x256xf32> to vector<32x128xf32>
    %c40 = arith.constant 40 : index
    %c0_42 = arith.constant 0 : index
    %128 = vector.load %arg4[%c40, %c0_42] : memref<48x128xf32, #tpu.memory_space<vmem>>, vector<1x128xf32>
    %129 = vector.broadcast %128 : vector<1x128xf32> to vector<32x128xf32>
    %130 = arith.addf %127, %129 : vector<32x128xf32>
    %131 = arith.negf %130 : vector<32x128xf32>
    %132 = math.exp %131 : vector<32x128xf32>
    %cst_43 = arith.constant 1.000000e+00 : f32
    %133 = vector.broadcast %cst_43 : f32 to vector<32x128xf32>
    %134 = arith.addf %133, %132 : vector<32x128xf32>
    %135 = arith.divf %133, %134 : vector<32x128xf32>
    %136 = arith.mulf %126, %135 : vector<32x128xf32>
    %137 = arith.addf %136, %111 : vector<32x128xf32>
    %c41 = arith.constant 41 : index
    %c0_44 = arith.constant 0 : index
    %138 = vector.load %arg4[%c41, %c0_44] : memref<48x128xf32, #tpu.memory_space<vmem>>, vector<1x128xf32>
    %c42 = arith.constant 42 : index
    %c0_45 = arith.constant 0 : index
    %139 = vector.load %arg4[%c42, %c0_45] : memref<48x128xf32, #tpu.memory_space<vmem>>, vector<1x128xf32>
    %cst_46 = arith.constant dense<0.000000e+00> : vector<32xf32>
    %140 = vector.multi_reduction <add>, %137, %cst_46 [1] : vector<32x128xf32> to vector<32xf32>
    %141 = vector.shape_cast %140 : vector<32xf32> to vector<32x1xf32>
    %cst_47 = arith.constant 1.280000e+02 : f32
    %142 = vector.broadcast %cst_47 : f32 to vector<32x1xf32>
    %143 = arith.divf %141, %142 : vector<32x1xf32>
    %144 = vector.broadcast %143 : vector<32x1xf32> to vector<32x128xf32>
    %145 = arith.subf %137, %144 : vector<32x128xf32>
    %146 = arith.mulf %145, %145 : vector<32x128xf32>
    %cst_48 = arith.constant dense<0.000000e+00> : vector<32xf32>
    %147 = vector.multi_reduction <add>, %146, %cst_48 [1] : vector<32x128xf32> to vector<32xf32>
    %148 = vector.shape_cast %147 : vector<32xf32> to vector<32x1xf32>
    %cst_49 = arith.constant 1.280000e+02 : f32
    %149 = vector.broadcast %cst_49 : f32 to vector<32x1xf32>
    %150 = arith.divf %148, %149 : vector<32x1xf32>
    %151 = vector.broadcast %143 : vector<32x1xf32> to vector<32x128xf32>
    %152 = arith.subf %137, %151 : vector<32x128xf32>
    %cst_50 = arith.constant 9.99999974E-6 : f32
    %153 = vector.broadcast %cst_50 : f32 to vector<32x1xf32>
    %154 = arith.addf %150, %153 : vector<32x1xf32>
    %155 = math.rsqrt %154 : vector<32x1xf32>
    %156 = vector.broadcast %155 : vector<32x1xf32> to vector<32x128xf32>
    %157 = arith.mulf %152, %156 : vector<32x128xf32>
    %158 = vector.broadcast %138 : vector<1x128xf32> to vector<32x128xf32>
    %159 = arith.mulf %157, %158 : vector<32x128xf32>
    %160 = vector.broadcast %139 : vector<1x128xf32> to vector<32x128xf32>
    %161 = arith.addf %159, %160 : vector<32x128xf32>
    %c43 = arith.constant 43 : index
    %c0_51 = arith.constant 0 : index
    %162 = vector.load %arg4[%c43, %c0_51] : memref<48x128xf32, #tpu.memory_space<vmem>>, vector<1x128xf32>
    %c44 = arith.constant 44 : index
    %c0_52 = arith.constant 0 : index
    %163 = vector.load %arg4[%c44, %c0_52] : memref<48x128xf32, #tpu.memory_space<vmem>>, vector<1x128xf32>
    %cst_53 = arith.constant dense<0.000000e+00> : vector<32xf32>
    %164 = vector.multi_reduction <add>, %161, %cst_53 [1] : vector<32x128xf32> to vector<32xf32>
    %165 = vector.shape_cast %164 : vector<32xf32> to vector<32x1xf32>
    %cst_54 = arith.constant 1.280000e+02 : f32
    %166 = vector.broadcast %cst_54 : f32 to vector<32x1xf32>
    %167 = arith.divf %165, %166 : vector<32x1xf32>
    %168 = vector.broadcast %167 : vector<32x1xf32> to vector<32x128xf32>
    %169 = arith.subf %161, %168 : vector<32x128xf32>
    %170 = arith.mulf %169, %169 : vector<32x128xf32>
    %cst_55 = arith.constant dense<0.000000e+00> : vector<32xf32>
    %171 = vector.multi_reduction <add>, %170, %cst_55 [1] : vector<32x128xf32> to vector<32xf32>
    %172 = vector.shape_cast %171 : vector<32xf32> to vector<32x1xf32>
    %cst_56 = arith.constant 1.280000e+02 : f32
    %173 = vector.broadcast %cst_56 : f32 to vector<32x1xf32>
    %174 = arith.divf %172, %173 : vector<32x1xf32>
    %175 = vector.broadcast %167 : vector<32x1xf32> to vector<32x128xf32>
    %176 = arith.subf %161, %175 : vector<32x128xf32>
    %cst_57 = arith.constant 9.99999974E-6 : f32
    %177 = vector.broadcast %cst_57 : f32 to vector<32x1xf32>
    %178 = arith.addf %174, %177 : vector<32x1xf32>
    %179 = math.rsqrt %178 : vector<32x1xf32>
    %180 = vector.broadcast %179 : vector<32x1xf32> to vector<32x128xf32>
    %181 = arith.mulf %176, %180 : vector<32x128xf32>
    %182 = vector.broadcast %162 : vector<1x128xf32> to vector<32x128xf32>
    %183 = arith.mulf %181, %182 : vector<32x128xf32>
    %184 = vector.broadcast %163 : vector<1x128xf32> to vector<32x128xf32>
    %185 = arith.addf %183, %184 : vector<32x128xf32>
    %186 = arith.truncf %185 : vector<32x128xf32> to vector<32x128xbf16>
    %cst_58 = arith.constant dense<0.000000e+00> : vector<32x128xf32>
    %187 = tpu.matmul %186, %1, %cst_58 {dimension_numbers = #tpu.dot_dimension_numbers<[1], [0], [0], [1], [0, 0, 1, 1], [], []>} : vector<32x128xbf16>, vector<128x128xbf16>, vector<32x128xf32> -> vector<32x128xf32>
    %c45 = arith.constant 45 : index
    %c0_59 = arith.constant 0 : index
    %188 = vector.load %arg4[%c45, %c0_59] : memref<48x128xf32, #tpu.memory_space<vmem>>, vector<1x128xf32>
    %189 = vector.broadcast %188 : vector<1x128xf32> to vector<32x128xf32>
    %190 = arith.addf %187, %189 : vector<32x128xf32>
    %c0_60 = arith.constant 0 : index
    %c0_61 = arith.constant 0 : index
    %191 = vector.load %arg5[%c0_60, %c0_61] : memref<32x128xf32, #tpu.memory_space<vmem>>, vector<32x128xf32>
    tpu.vector_store %arg5[%c0_60, %c0_61], %190 {strides = array<i32>} : memref<32x128xf32, #tpu.memory_space<vmem>>, vector<32x128xf32>,
    return
  }
}

</mosaic_0001>

<bundles_post_ra>
// kernel: autoencoder_forward.1
= control target key start
LH: loop header
LB: loop body
LE: loop exit
PB: predicated region body
PF: predicated region fallthrough
CT: control target
= control target key end

     0   :  { %10 = vsyncpa [#allocation3], 0  ;;  %s3567_s0 = inlined_call_operand.hbm [shape: f32[8,128], index: 0, kind: input, shape index: {}]   ;;  %s3568_s1 = inlined_call_operand.hbm [shape: f32[8,128], index: 1, kind: input, shape index: {}]   ;;  %s3569_s2 = inlined_call_operand.hbm [shape: bf16[128,768], index: 2, kind: input, shape index: {}]   ;;  %s3570_s3 = inlined_call_operand.hbm [shape: bf16[2,384,256], index: 3, kind: input, shape index: {}]   ;;  %s3571_s4 = inlined_call_operand.hbm [shape: f32[48,128], index: 4, kind: input, shape index: {}]   ;;  %s3572_s5 = inlined_call_operand.hbm [shape: f32[32,128], index: 5, kind: output, shape index: {}]  }
   0x1   :  { %11 = vsyncpa [#allocation6], 0 }
   0x2   :  { %12 = vsyncpa [#allocation9], 0  ;;  %s30_s20 = sshll.u32 %s3568_s1, 4  ;;  %s31_s20 = int_to_ptr.hbm [resolvable:$true] %s30_s20 }
   0x3   :  { %13 = vsyncpa [#allocation4], 0  ;;  %s3078_s21 = smov [#allocation5]   ;;  %s53_s25 = sshll.u32 %s3570_s3, 4  ;;  %s54_s25 = int_to_ptr.hbm [resolvable:$true] %s53_s25 }
   0x4   :  { %s32_s22 = sshll.u32 %s3078_s21, 4  ;;  %s3079_s26 = smov [#allocation8]   ;;  %s33_s22 = int_to_ptr.vmem [resolvable:$true] %s32_s22 }
   0x5   :  { %35 = dma.hbm_to_vmem [thread:$0]  %s31_s20, 128, %s33_s22, [#allocation6]  }
   0x6   :  { %s55_s27 = sshll.u32 %s3079_s26, 4  ;;  %s3080_s28 = smov 128   ;;  %s56_s27 = int_to_ptr.vmem [resolvable:$true] %s55_s27 }
   0x7   :  { %s3081_s29 = smov 8   ;;  %s19_s6 = sshll.u32 %s3567_s0, 4  ;;  %s20_s6 = int_to_ptr.hbm [resolvable:$true] %s19_s6 }
   0x8   :  { %61 = dma.hbm_to_vmem [thread:$0]  %s54_s25, 12288, %s56_s27, [#allocation9], %s3080_s28, %s3080_s28, %s3081_s29  }
   0x9   :  { %s3082_s7 = smov [#allocation2]   ;;  %s40_s10 = sshll.u32 %s3569_s2, 4  ;;  %s41_s10 = int_to_ptr.hbm [resolvable:$true] %s40_s10 }
   0xa   :  { %s21_s8 = sshll.u32 %s3082_s7, 4  ;;  %s3083_s11 = smov [#allocation7]   ;;  %s22_s8 = int_to_ptr.vmem [resolvable:$true] %s21_s8 }
   0xb   :  { %24 = dma.hbm_to_vmem [thread:$0]  %s20_s6, 128, %s22_s8, [#allocation3]  }
   0xc   :  { %s42_s12 = sshll.u32 %s3083_s11, 4  ;;  %s3084_s13 = smov 384   ;;  %s43_s12 = int_to_ptr.vmem [resolvable:$true] %s42_s12 }
   0xd   :  { %s3085_s14 = smov 24   ;;  %s66_s0 = sshll.u32 %s3571_s4, 4  ;;  %s67_s0 = int_to_ptr.hbm [resolvable:$true] %s66_s0 }
   0xe   :  { %48 = dma.hbm_to_vmem [thread:$0]  %s41_s10, 6144, %s43_s12, [#allocation6], %s3084_s13, %s3084_s13, %s3085_s14  }
   0xf   :  { %s3086_s17 = smov [#allocation10]  }
  0x10   :  { %s68_s18 = sshll.u32 %s3086_s17, 4  ;;  %s69_s18 = int_to_ptr.vmem [resolvable:$true] %s68_s18 }
  0x11   :  { %74 = dma.hbm_to_vmem [thread:$0]  %s67_s0, 768, %s69_s18, [#allocation9], %s3080_s28, %s3080_s28, %s3081_s29  }
  0x12   :  { %3070 = dma.done.wait [#allocation3], 128  }
  0x13   :  { %3071 = vsyncadd [#allocation3], 4294967168 }
  0x14   :  { %3072 = dma.done.wait [#allocation6], 6272  }
  0x15   :  { %3073 = vsyncadd [#allocation6], 4294961024 }
  0x16   :  { %3074 = dma.done.wait [#allocation9], 13056  }
  0x17   :  { %3075 = vsyncadd [#allocation9], 4294954240  ;;  %v2111_v0 = vld [vmem:[#allocation7 + $0x150] sm:$0xf]  ;;  %v2676_v1 = vld [vmem:[#allocation7 + $0x164] sm:$0xf0] }
  0x18   :  { %v2107_v2 = vld [vmem:[#allocation7 + $0x120] sm:$0xf]  ;;  %v2112_v3 = vor.u32 %v2676_v1, %v2111_v0  ;;  %v2675_v4 = vld [vmem:[#allocation7 + $0x134] sm:$0xf0]  ;;  %v2103_v6 = vld [vmem:[#allocation7 + $0xf0] sm:$0xf] }
  0x19   :  { %v2108_v5 = vor.u32 %v2675_v4, %v2107_v2  ;;  %v2674_v7 = vld [vmem:[#allocation7 + $0x104] sm:$0xf0]  ;;  %v2099_v8 = vld [vmem:[#allocation7 + $0xc0] sm:$0xf]  ;;  %v2673_v9 = vld [vmem:[#allocation7 + $0xd4] sm:$0xf0] }
  0x1a   :  { %211 = vmatpush.bf16.msra.mxu0 %v2112_v3  ;;  %v2104_v10 = vor.u32 %v2674_v7, %v2103_v6  ;;  %v2100_v11 = vor.u32 %v2673_v9, %v2099_v8  ;;  %v2095_v12 = vld [vmem:[#allocation7 + $0x90] sm:$0xf]  ;;  %v2672_v13 = vld [vmem:[#allocation7 + $0xa4] sm:$0xf0]  ;;  %v2091_v15 = vld [vmem:[#allocation7 + $0x60] sm:$0xf] }
  0x1b   :  { %v2096_v14 = vor.u32 %v2672_v13, %v2095_v12  ;;  %v2671_v16 = vld [vmem:[#allocation7 + $0x74] sm:$0xf0]  ;;  %v2087_v18 = vld [vmem:[#allocation7 + $0x30] sm:$0xf]  ;;  %v2670_v19 = vld [vmem:[#allocation7 + $0x44] sm:$0xf0] }
  0x1c   :  { %v2092_v17 = vor.u32 %v2671_v16, %v2091_v15  ;;  %v2088_v20 = vor.u32 %v2670_v19, %v2087_v18  ;;  %v2083_v21 = vld [vmem:[#allocation7] sm:$0xf]  ;;  %v2669_v22 = vld [vmem:[#allocation7 + $0x14] sm:$0xf0]  ;;  %v159_v24 = vld [vmem:[#allocation2] sm:$0xff]  ;;  %vm469_vm4 = vcmask 1041408  }
  0x1d   :  { %v2084_v23 = vor.u32 %v2669_v22, %v2083_v21  ;;  %v160_v25 = vpack.c.bf16 %v159_v24, %v159_v24  ;;  %v2842_v26 = vld [vmem:[#allocation10 + $0x20] ss:$0 sm:$0xff]  ;;  %v224_v28 = vld [vmem:[#allocation5] sm:$0xff]  ;;  %v2715_v34 = vld [vmem:[#allocation7 + $0x16c] sm:$0xf0]  ;;  %vm471_vm5 = vcmask 1045508  }
  0x1e   :  { %212 = vmatpush.bf16.msra.mxu0 %v2108_v5  ;;  %v2227_v33 = vld [vmem:[#allocation7 + $0x158] sm:$0xf]  ;;  %v2713_v35 = vld [vmem:[#allocation7 + $0x15c] sm:$0xf]  ;;  %v2229_v37 = vld [vmem:[#allocation7 + $0x170] sm:$0xf0] }
  0x1f   :  { %v2228_v36 = vor.u32 %v2715_v34, %v2227_v33  ;;  %v2235_v38 = vld [vmem:[#allocation7 + $0x160] sm:$0xf]  ;;  %v2716_v39 = vld [vmem:[#allocation7 + $0x174] sm:$0xf0]  ;;  %v2232_v40 = vor.u32 %v2713_v35, %v2229_v37  ;;  %v2714_v42 = vld [vmem:[#allocation7 + $0x164] sm:$0xf] }
  0x20   :  { %v2236_v41 = vor.u32 %v2716_v39, %v2235_v38  ;;  %v2237_v43 = vld [vmem:[#allocation7 + $0x178] sm:$0xf0]  ;;  %v2211_v44 = vld [vmem:[#allocation7 + $0x128] sm:$0xf]  ;;  %v2711_v46 = vld [vmem:[#allocation7 + $0x13c] sm:$0xf0] }
  0x21   :  { %410 = vmatpush.bf16.msra.mxu1 %v2228_v36  ;;  %v2240_v45 = vor.u32 %v2714_v42, %v2237_v43  ;;  %v2709_v47 = vld [vmem:[#allocation7 + $0x12c] sm:$0xf]  ;;  %v2213_v48 = vld [vmem:[#allocation7 + $0x140] sm:$0xf0]  ;;  %423 = vmatpush.bf16.msra.mxu2 %v2232_v40  ;;  %v2212_v49 = vor.u32 %v2711_v46, %v2211_v44  ;;  %v2219_v51 = vld [vmem:[#allocation7 + $0x130] sm:$0xf] }
  0x22   :  { %213 = vmatpush.bf16.msra.mxu0 %v2104_v10  ;;  %436 = vmatpush.bf16.msra.mxu3 %v2236_v41  ;;  %v2216_v50 = vor.u32 %v2709_v47, %v2213_v48  ;;  %v2712_v52 = vld [vmem:[#allocation7 + $0x144] sm:$0xf0]  ;;  %v2710_v53 = vld [vmem:[#allocation7 + $0x134] sm:$0xf]  ;;  %v2221_v55 = vld [vmem:[#allocation7 + $0x148] sm:$0xf0] }
  0x23   :  { %v2220_v54 = vor.u32 %v2712_v52, %v2219_v51  ;;  %v2195_v56 = vld [vmem:[#allocation7 + $0xf8] sm:$0xf]  ;;  %v2707_v57 = vld [vmem:[#allocation7 + $0x10c] sm:$0xf0]  ;;  %v2224_v58 = vor.u32 %v2710_v53, %v2221_v55  ;;  %v2705_v59 = vld [vmem:[#allocation7 + $0xfc] sm:$0xf] }
  0x24   :  { %v2197_v60 = vld [vmem:[#allocation7 + $0x110] sm:$0xf0]  ;;  %v2203_v61 = vld [vmem:[#allocation7 + $0x100] sm:$0xf]  ;;  %v2196_v62 = vor.u32 %v2707_v57, %v2195_v56  ;;  %v2708_v63 = vld [vmem:[#allocation7 + $0x114] sm:$0xf0] }
  0x25   :  { %411 = vmatpush.bf16.msra.mxu1 %v2212_v49  ;;  %v2706_v0 = vld [vmem:[#allocation7 + $0x104] sm:$0xf]  ;;  %v2205_v1 = vld [vmem:[#allocation7 + $0x118] sm:$0xf0]  ;;  %424 = vmatpush.bf16.msra.mxu2 %v2216_v50  ;;  %v2200_v2 = vor.u32 %v2705_v59, %v2197_v60  ;;  %v2204_v3 = vor.u32 %v2708_v63, %v2203_v61  ;;  %v2179_v9 = vld [vmem:[#allocation7 + $0xc8] sm:$0xf] }
  0x26   :  { %214 = vmatpush.bf16.msra.mxu0 %v2100_v11  ;;  %437 = vmatpush.bf16.msra.mxu3 %v2220_v54  ;;  %v2208_v4 = vor.u32 %v2706_v0, %v2205_v1  ;;  %v2703_v10 = vld [vmem:[#allocation7 + $0xdc] sm:$0xf0]  ;;  %v2701_v11 = vld [vmem:[#allocation7 + $0xcc] sm:$0xf]  ;;  %v2181_v13 = vld [vmem:[#allocation7 + $0xe0] sm:$0xf0] }
  0x27   :  { %v2180_v12 = vor.u32 %v2703_v10, %v2179_v9  ;;  %v2704_v15 = vld [vmem:[#allocation7 + $0xe4] sm:$0xf0]  ;;  %v2184_v16 = vor.u32 %v2701_v11, %v2181_v13  ;;  %v2702_v18 = vld [vmem:[#allocation7 + $0xd4] sm:$0xf]  ;;  %v2189_v19 = vld [vmem:[#allocation7 + $0xe8] sm:$0xf0] }
  0x28   :  { %v2163_v21 = vld [vmem:[#allocation7 + $0x98] sm:$0xf]  ;;  %v2699_v22 = vld [vmem:[#allocation7 + $0xac] sm:$0xf0]  ;;  %v2147_v33 = vld [vmem:[#allocation7 + $0x68] sm:$0xf] }
  0x29   :  { %412 = vmatpush.bf16.msra.mxu1 %v2196_v62  ;;  %425 = vmatpush.bf16.msra.mxu2 %v2200_v2  ;;  %v2164_v24 = vor.u32 %v2699_v22, %v2163_v21  ;;  %v2695_v34 = vld [vmem:[#allocation7 + $0x7c] sm:$0xf0]  ;;  %v2693_v35 = vld [vmem:[#allocation7 + $0x6c] sm:$0xf]  ;;  %v2149_v37 = vld [vmem:[#allocation7 + $0x80] sm:$0xf0] }
  0x2a   :  { %215 = vmatpush.bf16.msra.mxu0 %v2096_v14  ;;  %438 = vmatpush.bf16.msra.mxu3 %v2204_v3  ;;  %v2187_v14 = vld [vmem:[#allocation7 + $0xd0] sm:$0xf]  ;;  %v2148_v36 = vor.u32 %v2695_v34, %v2147_v33  ;;  %v2696_v39 = vld [vmem:[#allocation7 + $0x84] sm:$0xf0]  ;;  %v2152_v40 = vor.u32 %v2693_v35, %v2149_v37  ;;  %v2694_v42 = vld [vmem:[#allocation7 + $0x74] sm:$0xf] }
  0x2b   :  { %v2155_v38 = vld [vmem:[#allocation7 + $0x70] sm:$0xf]  ;;  %v2157_v43 = vld [vmem:[#allocation7 + $0x88] sm:$0xf0]  ;;  %v2689_v47 = vld [vmem:[#allocation7 + $0x3c] sm:$0xf] }
  0x2c   :  { %v2156_v41 = vor.u32 %v2696_v39, %v2155_v38  ;;  %v2160_v44 = vor.u32 %v2694_v42, %v2157_v43  ;;  %v2691_v46 = vld [vmem:[#allocation7 + $0x4c] sm:$0xf0]  ;;  %v2133_v49 = vld [vmem:[#allocation7 + $0x50] sm:$0xf0]  ;;  %v2139_v50 = vld [vmem:[#allocation7 + $0x40] sm:$0xf] }
  0x2d   :  { %413 = vmatpush.bf16.msra.mxu1 %v2180_v12  ;;  %426 = vmatpush.bf16.msra.mxu2 %v2184_v16  ;;  %v2692_v51 = vld [vmem:[#allocation7 + $0x54] sm:$0xf0]  ;;  %v2136_v52 = vor.u32 %v2689_v47, %v2133_v49  ;;  %v2690_v54 = vld [vmem:[#allocation7 + $0x44] sm:$0xf]  ;;  %v2141_v55 = vld [vmem:[#allocation7 + $0x58] sm:$0xf0] }
  0x2e   :  { %216 = vmatpush.bf16.msra.mxu0 %v2092_v17  ;;  %v2188_v17 = vor.u32 %v2704_v15, %v2187_v14  ;;  %v2140_v53 = vor.u32 %v2692_v51, %v2139_v50  ;;  %v2115_v56 = vld [vmem:[#allocation7 + $0x8] sm:$0xf]  ;;  %v2144_v57 = vor.u32 %v2690_v54, %v2141_v55  ;;  %v2685_v59 = vld [vmem:[#allocation7 + $0xc] sm:$0xf]  ;;  %v2117_v60 = vld [vmem:[#allocation7 + $0x20] sm:$0xf0] }
  0x2f   :  { %v2120_v62 = vor.u32 %v2685_v59, %v2117_v60  ;;  %v2123_v63 = vld [vmem:[#allocation7 + $0x10] sm:$0xf]  ;;  %v2688_v0 = vld [vmem:[#allocation7 + $0x24] sm:$0xf0]  ;;  %v2686_v1 = vld [vmem:[#allocation7 + $0x14] sm:$0xf] }
  0x30   :  { %439 = vmatpush.bf16.msra.mxu3 %v2188_v17  ;;  %v2124_v2 = vor.u32 %v2688_v0, %v2123_v63  ;;  %v2125_v3 = vld [vmem:[#allocation7 + $0x28] sm:$0xf0]  ;;  %v3087_v21 = vmov 1966171168   ;;  %vm475_vm6 = vcmask 1043458   ;;  %vm477_vm7 = vcmask 1045504  }
  0x31   :  { %414 = vmatpush.bf16.msra.mxu1 %v2164_v24  ;;  %v495_v22 = vunpack.c.l.s4 %v3087_v21  ;;  %vm473_vm8 = vcmask 1043456   ;;  %vm479_vm9 = vcmask 1045506   ;;  %v510_v39 = vld [vmem:[#allocation10] sm:$0xff]  ;;  %v513_v54 = vld [vmem:[#allocation10 + $0x18] sm:$0xff]  ;;  %v3088_v59 = vmov 128.0   ;;  %s3090_s2 = smov [#allocation11]  }
  0x32   :  { %217 = vmatpush.bf16.msra.mxu0 %v2088_v20  ;;  %v2192_v20 = vor.u32 %v2702_v18, %v2189_v19  ;;  %s2064_s4 = sshll.u32 %s3090_s2, 4  ;;  %s2066_s21 = sshll.u32 %s3572_s5, 4  ;;  %s2065_s4 = int_to_ptr.vmem [resolvable:$true] %s2064_s4  ;;  %s2067_s21 = int_to_ptr.hbm [resolvable:$true] %s2066_s21 }
  0x35   :  { %415 = vmatpush.bf16.msra.mxu1 %v2148_v36 }
  0x36   :  { %218 = vmatpush.bf16.msra.mxu0 %v2084_v23  ;;  %v2697_v23 = vld [vmem:[#allocation7 + $0x9c] sm:$0xf] }
  0x39   :  { %219 = vmatmul.bf16.vlgmr.msra.gmra.mxu0 %v160_v25  ;;  %v2165_v25 = vld [vmem:[#allocation7 + $0xb0] sm:$0xf0] }
  0x3a   :  { %449 = vmatpush.bf16.msrb.mxu0 %v2240_v45  ;;  %v2131_v45 = vld [vmem:[#allocation7 + $0x38] sm:$0xf] }
  0x3b   :  { %v2132_v48 = vor.u32 %v2691_v46, %v2131_v45 }
  0x3d   :  { %416 = vmatpush.bf16.msra.mxu1 %v2132_v48 }
  0x3e   :  { %450 = vmatpush.bf16.msrb.mxu0 %v2224_v58  ;;  %v2687_v58 = vld [vmem:[#allocation7 + $0x1c] sm:$0xf0] }
  0x3f   :  { %v2116_v61 = vor.u32 %v2687_v58, %v2115_v56  ;;  %v512_v56 = vld [vmem:[#allocation10 + $0x10] sm:$0xff] }
  0x41   :  { %417 = vmatpush.bf16.msra.mxu1 %v2116_v61 }
  0x42   :  { %451 = vmatpush.bf16.msrb.mxu0 %v2208_v4  ;;  %v2128_v4 = vor.u32 %v2686_v1, %v2125_v3 }
  0x46   :  { %452 = vmatpush.bf16.msrb.mxu0 %v2192_v20 }
  0xb6   :  { %v220_v27 = vpop.f32.mrf.mxu0 }
  0xb7   :  { %v221_v29 = vadd.f32 %v2842_v26, %v220_v27  ;;  %v2171_v26 = vld [vmem:[#allocation7 + $0xa0] sm:$0xf]  ;;  %v2700_v27 = vld [vmem:[#allocation7 + $0xb4] sm:$0xf0] }
  0xb9   :  { %v225_v30 = vadd.f32 %v224_v28, %v221_v29  ;;  %v2168_v28 = vor.u32 %v2697_v23, %v2165_v25  ;;  %v2172_v29 = vor.u32 %v2700_v27, %v2171_v26 }
  0xbb   :  { %v226_v31 = vmul.f32 0.5, %v225_v30  ;;  %v2698_v30 = vld [vmem:[#allocation7 + $0xa4] sm:$0xf]  ;;  %427 = vmatpush.bf16.msra.mxu2 %v2168_v28  ;;  %440 = vmatpush.bf16.msra.mxu3 %v2172_v29  ;;  %v496_v28 = vunpack.c.0.s8 %v495_v22  ;;  %v2359_v22 = vld [vmem:[#allocation8 + $0xe0] sm:$0xf] }
  0xbd   :  { %227 = vmax.xlane.f32.xlu0 %v226_v31 }
  0xbe   :  { %v222_v32 = vpop.f32.mrf.mxu0 }
  0xbf   :  { %428 = vmatpush.bf16.msra.mxu2 %v2152_v40  ;;  %441 = vmatpush.bf16.msra.mxu3 %v2156_v41 }
  0xc3   :  { %429 = vmatpush.bf16.msra.mxu2 %v2136_v52  ;;  %442 = vmatpush.bf16.msra.mxu3 %v2140_v53 }
  0xc7   :  { %430 = vmatpush.bf16.msra.mxu2 %v2120_v62  ;;  %443 = vmatpush.bf16.msra.mxu3 %v2124_v2 }
 0x130   :  { %v228_v5 = vpop.xlane.xlu0 %227 }
 0x131   :  { %v229_v6 = vsub.f32 %v226_v31, %v228_v5  ;;  %v2173_v31 = vld [vmem:[#allocation7 + $0xb8] sm:$0xf0] }
 0x132   :  { %v2176_v32 = vor.u32 %v2698_v30, %v2173_v31 }
 0x133   :  { %v230_v7 = vmul.f32 1.442695, %v229_v6 }
 0x134   :  { %453 = vmatpush.bf16.msrb.mxu0 %v2176_v32 }
 0x135   :  { %2856 = vpow2.f32 %v230_v7 }
 0x138   :  { %454 = vmatpush.bf16.msrb.mxu0 %v2160_v44  ;;  %v511_v44 = vld [vmem:[#allocation10 + $0x8] sm:$0xff] }
 0x13b   :  { %v3142_v8 = vpop.eup %2856 }
 0x13c   :  { %232 = vadd.xlane.f32.xlu0 %v3142_v8  ;;  %455 = vmatpush.bf16.msrb.mxu0 %v2144_v57 }
 0x140   :  { %456 = vmatpush.bf16.msrb.mxu0 %v2128_v4 }
 0x1af   :  { %v233_v5 = vpop.xlane.xlu0 %232 }
 0x1b0   :  { %2858 = vrcp.f32 %v233_v5  ;;  %v245_v10 = vand.u32 2147483648, %v233_v5  ;;  %v243_v12 = vand.u32 2147483647, %v233_v5  ;;  %vm239_vm1 = vweird.f32 %v233_v5 }
 0x1b1   :  { %2860 = vrcp.f32 %v3088_v59 }
 0x1b2   :  { %v246_v14 = vor.u32 1.1754944e-38, %v245_v10  ;;  %vm244_vm3 = vcmp.eq.f32.partialorder %v243_v12, 8.507059e+37 }
 0x1b6   :  { %v2859_v6 = vpop.eup %2858 }
 0x1b7   :  { %v235_v7 = vmul.f32 %v2859_v6, %v233_v5  ;;  %vm240_vm0 = vweird.f32 %v2859_v6  ;;  %v2861_v60 = vpop.eup %2860 }
 0x1b8   :  { %vm241_vm2 = vmor %vm239_vm1, %vm240_vm0  ;;  %v529_v61 = vmul.f32 128.0, %v2861_v60  ;;  %vm533_vm10 = vweird.f32 %v2861_v60 }
 0x1b9   :  { %v236_v9 = vsub.f32 1.0, %v235_v7 }
 0x1ba   :  { %v530_v62 = vsub.f32 1.0, %v529_v61  ;;  %v2760_v61 = vld [vmem:[#allocation8 + $0x154] sm:$0xf0] }
 0x1bb   :  { %v237_v11 = vmul.f32 %v2859_v6, %v236_v9 }
 0x1bc   :  { %v531_v63 = vmul.f32 %v2861_v60, %v530_v62 }
 0x1bd   :  { %v238_v13 = vadd.f32 %v2859_v6, %v237_v11 }
 0x1be   :  { %v532_v0 = vadd.f32 %v2861_v60, %v531_v63  ;;  %v2279_v63 = vld [vmem:[#allocation8 + $0x40] sm:$0xf] }
 0x1bf   :  { %v242_v15 = vsel %vm241_vm2, %v2859_v6, %v238_v13 }
 0x1c0   :  { %v247_v16 = vsel %vm244_vm3, %v246_v14, %v242_v15  ;;  %v3154_v1 = vsel %vm533_vm10, %v2861_v60, %v532_v0  ;;  %v2415_v60 = vld [vmem:[#allocation8 + $0x150] sm:$0xf]  ;;  %v2726_v0 = vld [vmem:[#allocation8 + $0x44] sm:$0xf0] }
 0x1c1   :  { %v248_v17 = vmul.f32 %v3142_v8, %v247_v16  ;;  %v2416_v62 = vor.u32 %v2760_v61, %v2415_v60  ;;  %v2717_v61 = vld [vmem:[#allocation8 + $0x4] sm:$0xf] }
 0x1c3   :  { %v249_v18 = vpack.c.bf16 %v248_v17, %v248_v17 }
 0x1c5   :  { %418 = vmatmul.bf16.vlgmr.msra.gmra.mxu1 %v249_v18  ;;  %431 = vmatmul.bf16.vlgmr.msra.gmra.mxu2 %v249_v18 }
 0x1c6   :  { %444 = vmatmul.bf16.vlgmr.msra.gmra.mxu3 %v249_v18  ;;  %457 = vmatmul.bf16.vlgmr.msrb.gmra.mxu0 %v249_v18 }
 0x242   :  { %v419_v19 = vpop.f32.mrf.mxu1 }
 0x243   :  { %v458_v20 = vpop.f32.mrf.mxu0 }
 0x244   :  { %v468_v26 = vrot.slane %v458_v20, 2  ;;  %v2748_v20 = vld [vmem:[#allocation8 + $0xf4] sm:$0xf0] }
 0x248   :  { %v432_v23 = vpop.f32.mrf.mxu2 }
 0x249   :  { %v466_v24 = vrot.slane %v432_v23, 6  ;;  %v445_v25 = vpop.f32.mrf.mxu3  ;;  %v2746_v23 = vld [vmem:[#allocation8 + $0xe4] sm:$0xf0] }
 0x24a   :  { %v467_v27 = vrot.slane %v445_v25, 4  ;;  %v421_v8 = vpop.f32.mrf.mxu1  ;;  %v2351_v25 = vld [vmem:[#allocation8 + $0xd0] sm:$0xf] }
 0x24b   :  { %v460_v29 = vpop.f32.mrf.mxu0  ;;  %v470_v30 = vsel %vm469_vm4, %v419_v19, %v466_v24  ;;  %v476_v31 = vsel %vm475_vm6, %v419_v19, %v466_v24  ;;  %v486_v32 = vsel %vm477_vm7, %v466_v24, %v419_v19  ;;  %v482_v33 = vsel %vm471_vm5, %v419_v19, %v466_v24  ;;  %v2367_v19 = vld [vmem:[#allocation8 + $0xf0] sm:$0xf] }
 0x24c   :  { %v472_v34 = vsel %vm471_vm5, %v467_v27, %v468_v26  ;;  %v478_v35 = vsel %vm477_vm7, %v468_v26, %v467_v27  ;;  %v487_v36 = vsel %vm475_vm6, %v467_v27, %v468_v26  ;;  %v483_v37 = vsel %vm469_vm4, %v467_v27, %v468_v26  ;;  %v2744_v26 = vld [vmem:[#allocation8 + $0xd4] sm:$0xf0]  ;;  %v2303_v8 = vld [vmem:[#allocation8 + $0x70] sm:$0xf]  ;;  %v2731_v29 = vld [vmem:[#allocation8 + $0x74] sm:$0xf] }
 0x24d   :  { %v474_v38 = vsel %vm473_vm8, %v470_v30, %v472_v34  ;;  %v480_v40 = vsel %vm479_vm9, %v476_v31, %v478_v35  ;;  %v488_v41 = vsel %vm479_vm9, %v487_v36, %v486_v32  ;;  %v484_v45 = vsel %vm473_vm8, %v483_v37, %v482_v33  ;;  %v2305_v31 = vld [vmem:[#allocation8 + $0x78] sm:$0xf0]  ;;  %v2343_v32 = vld [vmem:[#allocation8 + $0xc0] sm:$0xf]  ;;  %v2742_v33 = vld [vmem:[#allocation8 + $0xc4] sm:$0xf0] }
 0x24e   :  { %v497_v42 = vperm.slane %v474_v38, %v496_v28  ;;  %v481_v43 = vrot.slane %v480_v40, 2  ;;  %v489_v49 = vrot.slane %v488_v41, 6  ;;  %v485_v52 = vrot.slane %v484_v45, 4  ;;  %v2431_v36 = vld [vmem:[#allocation8 + $0x170] sm:$0xf] }
 0x24f   :  { %v2368_v21 = vor.u32 %v2748_v20, %v2367_v19  ;;  %v2360_v24 = vor.u32 %v2746_v23, %v2359_v22  ;;  %v2352_v27 = vor.u32 %v2744_v26, %v2351_v25  ;;  %v2308_v34 = vor.u32 %v2731_v29, %v2305_v31  ;;  %v2764_v37 = vld [vmem:[#allocation8 + $0x174] sm:$0xf0]  ;;  %v2730_v40 = vld [vmem:[#allocation8 + $0x64] sm:$0xf0]  ;;  %v2729_v41 = vld [vmem:[#allocation8 + $0x64] sm:$0xf] }
 0x250   :  { %v434_v46 = vpop.f32.mrf.mxu2  ;;  %v514_v47 = vadd.f32 %v510_v39, %v497_v42  ;;  %v501_v48 = vperm.slane %v481_v43, %v496_v28  ;;  %v509_v53 = vperm.slane %v489_v49, %v496_v28  ;;  %v505_v55 = vperm.slane %v485_v52, %v496_v28  ;;  %v2732_v28 = vld [vmem:[#allocation8 + $0x74] sm:$0xf0]  ;;  %v2295_v39 = vld [vmem:[#allocation8 + $0x60] sm:$0xf]  ;;  %v2297_v43 = vld [vmem:[#allocation8 + $0x68] sm:$0xf0] }
 0x251   :  { %v447_v50 = vpop.f32.mrf.mxu3  ;;  %989 = vmatpush.bf16.msrb.mxu2 %v2368_v21  ;;  %v2304_v30 = vor.u32 %v2732_v28, %v2303_v8  ;;  %v2344_v35 = vor.u32 %v2742_v33, %v2343_v32  ;;  %v2432_v38 = vor.u32 %v2764_v37, %v2431_v36  ;;  %1027 = vmatpush.bf16.msra.mxu0 %v2308_v34  ;;  %v2740_v45 = vld [vmem:[#allocation8 + $0xb4] sm:$0xf0]  ;;  %v2762_v49 = vld [vmem:[#allocation8 + $0x164] sm:$0xf0]  ;;  %v2723_v19 = vld [vmem:[#allocation8 + $0x34] sm:$0xf] }
 0x252   :  { %520 = vadd.xlane.f32.xlu1 %v514_v47  ;;  %v515_v51 = vadd.f32 %v511_v44, %v501_v48  ;;  %v517_v57 = vadd.f32 %v513_v54, %v509_v53  ;;  %v516_v58 = vadd.f32 %v512_v56, %v505_v55  ;;  %v2296_v42 = vor.u32 %v2730_v40, %v2295_v39  ;;  %v2335_v44 = vld [vmem:[#allocation8 + $0xb0] sm:$0xf]  ;;  %v2423_v48 = vld [vmem:[#allocation8 + $0x160] sm:$0xf]  ;;  %v2728_v52 = vld [vmem:[#allocation8 + $0x54] sm:$0xf0] }
 0x253   :  { %970 = vmatpush.bf16.msrb.mxu1 %v2304_v30  ;;  %1008 = vmatpush.bf16.msrb.mxu3 %v2432_v38  ;;  %v2300_v46 = vor.u32 %v2729_v41, %v2297_v43  ;;  %v2424_v50 = vor.u32 %v2762_v49, %v2423_v48  ;;  %v2727_v53 = vld [vmem:[#allocation8 + $0x54] sm:$0xf]  ;;  %v2289_v55 = vld [vmem:[#allocation8 + $0x58] sm:$0xf0]  ;;  %v2327_v56 = vld [vmem:[#allocation8 + $0xa0] sm:$0xf] }
 0x254   :  { %522 = vadd.xlane.f32.xlu2 %v515_v51  ;;  %v2273_v21 = vld [vmem:[#allocation8 + $0x38] sm:$0xf0]  ;;  %v2311_v22 = vld [vmem:[#allocation8 + $0x80] sm:$0xf]  ;;  %v2734_v23 = vld [vmem:[#allocation8 + $0x84] sm:$0xf0] }
 0x255   :  { %990 = vmatpush.bf16.msrb.mxu2 %v2360_v24  ;;  %1028 = vmatpush.bf16.msra.mxu0 %v2300_v46  ;;  %v2276_v24 = vor.u32 %v2723_v19, %v2273_v21  ;;  %v2312_v25 = vor.u32 %v2734_v23, %v2311_v22  ;;  %v2399_v26 = vld [vmem:[#allocation8 + $0x130] sm:$0xf]  ;;  %v2263_v28 = vld [vmem:[#allocation8 + $0x20] sm:$0xf]  ;;  %v2722_v29 = vld [vmem:[#allocation8 + $0x24] sm:$0xf0] }
 0x256   :  { %v2721_v30 = vld [vmem:[#allocation8 + $0x24] sm:$0xf]  ;;  %v2264_v32 = vor.u32 %v2722_v29, %v2263_v28  ;;  %v2265_v33 = vld [vmem:[#allocation8 + $0x28] sm:$0xf0]  ;;  %v2763_v34 = vld [vmem:[#allocation8 + $0x174] sm:$0xf] }
 0x257   :  { %971 = vmatpush.bf16.msrb.mxu1 %v2296_v42  ;;  %1009 = vmatpush.bf16.msrb.mxu3 %v2424_v50  ;;  %v2268_v37 = vor.u32 %v2721_v30, %v2265_v33  ;;  %v2391_v39 = vld [vmem:[#allocation8 + $0x120] sm:$0xf]  ;;  %v2754_v40 = vld [vmem:[#allocation8 + $0x124] sm:$0xf0]  ;;  %v2720_v46 = vld [vmem:[#allocation8 + $0x14] sm:$0xf0] }
 0x258   :  { %v2392_v42 = vor.u32 %v2754_v40, %v2391_v39  ;;  %v2719_v48 = vld [vmem:[#allocation8 + $0x14] sm:$0xf]  ;;  %v2257_v49 = vld [vmem:[#allocation8 + $0x18] sm:$0xf0]  ;;  %v2761_v50 = vld [vmem:[#allocation8 + $0x164] sm:$0xf] }
 0x259   :  { %991 = vmatpush.bf16.msrb.mxu2 %v2352_v27  ;;  %v2756_v27 = vld [vmem:[#allocation8 + $0x134] sm:$0xf0]  ;;  %v2757_v21 = vld [vmem:[#allocation8 + $0x144] sm:$0xf]  ;;  %v2361_v28 = vld [vmem:[#allocation8 + $0xe8] sm:$0xf0] }
 0x25a   :  { %526 = vadd.xlane.f32.xlu1 %v517_v57  ;;  %v2400_v8 = vor.u32 %v2756_v27, %v2399_v26  ;;  %v2755_v33 = vld [vmem:[#allocation8 + $0x134] sm:$0xf]  ;;  %v2753_v40 = vld [vmem:[#allocation8 + $0x124] sm:$0xf] }
 0x25b   :  { %1010 = vmatpush.bf16.msrb.mxu3 %v2416_v62  ;;  %v2249_v62 = vld [vmem:[#allocation8 + $0x8] sm:$0xf0] }
 0x25c   :  { %524 = vadd.xlane.f32.xlu2 %v516_v58 }
 0x25d   :  { %992 = vmatpush.bf16.msrb.mxu2 %v2344_v35  ;;  %v2433_v35 = vld [vmem:[#allocation8 + $0x178] sm:$0xf0] }
 0x25e   :  { %v2436_v38 = vor.u32 %v2763_v34, %v2433_v35  ;;  %v2401_v34 = vld [vmem:[#allocation8 + $0x138] sm:$0xf0] }
 0x25f   :  { %v2404_v35 = vor.u32 %v2755_v33, %v2401_v34 }
 0x2c5   :  { %v521_v2 = vpop.xlane.xlu1 %520 }
 0x2c6   :  { %v535_v3 = vmul.f32 %v3154_v1, %v521_v2  ;;  %v2725_v2 = vld [vmem:[#allocation8 + $0x44] sm:$0xf] }
 0x2c7   :  { %v523_v4 = vpop.xlane.xlu2 %522 }
 0x2c8   :  { %v3157_v5 = vsub.f32 %v514_v47, %v535_v3  ;;  %v536_v6 = vmul.f32 %v3154_v1, %v523_v4  ;;  %v2336_v47 = vor.u32 %v2740_v45, %v2335_v44  ;;  %v2280_v3 = vor.u32 %v2726_v0, %v2279_v63  ;;  %v2281_v4 = vld [vmem:[#allocation8 + $0x48] sm:$0xf0]  ;;  %v2255_v45 = vld [vmem:[#allocation8 + $0x10] sm:$0xf]  ;;  %v2759_v63 = vld [vmem:[#allocation8 + $0x154] sm:$0xf] }
 0x2ca   :  { %v3160_v7 = vsub.f32 %v515_v51, %v536_v6  ;;  %v543_v9 = vmul.f32 %v3157_v5, %v3157_v5  ;;  %993 = vmatpush.bf16.msrb.mxu2 %v2336_v47  ;;  %v2287_v51 = vld [vmem:[#allocation8 + $0x50] sm:$0xf]  ;;  %v2256_v47 = vor.u32 %v2720_v46, %v2255_v45 }
 0x2cb   :  { %v2288_v54 = vor.u32 %v2728_v52, %v2287_v51  ;;  %v2319_v6 = vld [vmem:[#allocation8 + $0x90] sm:$0xf]  ;;  %v2260_v52 = vor.u32 %v2719_v48, %v2257_v49  ;;  %v2741_v48 = vld [vmem:[#allocation8 + $0xc4] sm:$0xf]  ;;  %v2345_v49 = vld [vmem:[#allocation8 + $0xc8] sm:$0xf0] }
 0x2cc   :  { %547 = vadd.xlane.f32.xlu0 %v543_v9  ;;  %v544_v10 = vmul.f32 %v3160_v7, %v3160_v7  ;;  %v2736_v9 = vld [vmem:[#allocation8 + $0x94] sm:$0xf0] }
 0x2cd   :  { %v527_v11 = vpop.xlane.xlu1 %526  ;;  %972 = vmatpush.bf16.msrb.mxu1 %v2288_v54  ;;  %v2383_v54 = vld [vmem:[#allocation8 + $0x110] sm:$0xf] }
 0x2ce   :  { %v538_v12 = vmul.f32 %v3154_v1, %v527_v11  ;;  %549 = vadd.xlane.f32.xlu2 %v544_v10  ;;  %v2284_v10 = vor.u32 %v2725_v2, %v2281_v4  ;;  %v2320_v11 = vor.u32 %v2736_v9, %v2319_v6  ;;  %v2252_v2 = vor.u32 %v2717_v61, %v2249_v62  ;;  %v2375_v4 = vld [vmem:[#allocation8 + $0x100] sm:$0xf]  ;;  %v2750_v6 = vld [vmem:[#allocation8 + $0x104] sm:$0xf0] }
 0x2cf   :  { %v525_v13 = vpop.xlane.xlu2 %524  ;;  %v2348_v61 = vor.u32 %v2741_v48, %v2345_v49 }
 0x2d0   :  { %v3167_v14 = vsub.f32 %v517_v57, %v538_v12  ;;  %v537_v15 = vmul.f32 %v3154_v1, %v525_v13  ;;  %v2738_v57 = vld [vmem:[#allocation8 + $0xa4] sm:$0xf0]  ;;  %v2407_v12 = vld [vmem:[#allocation8 + $0x140] sm:$0xf] }
 0x2d1   :  { %v2328_v59 = vor.u32 %v2738_v57, %v2327_v56  ;;  %v2758_v13 = vld [vmem:[#allocation8 + $0x144] sm:$0xf0]  ;;  %973 = vmatpush.bf16.msrb.mxu1 %v2280_v3  ;;  %v2752_v56 = vld [vmem:[#allocation8 + $0x114] sm:$0xf0]  ;;  %v2247_v57 = vld [vmem:[#allocation8] sm:$0xf] }
 0x2d2   :  { %v3170_v16 = vsub.f32 %v516_v58, %v537_v15  ;;  %v546_v17 = vmul.f32 %v3167_v14, %v3167_v14  ;;  %v2292_v58 = vor.u32 %v2727_v53, %v2289_v55  ;;  %v2408_v15 = vor.u32 %v2758_v13, %v2407_v12  ;;  %v2425_v53 = vld [vmem:[#allocation8 + $0x168] sm:$0xf0]  ;;  %v2417_v3 = vld [vmem:[#allocation8 + $0x158] sm:$0xf0] }
 0x2d3   :  { %994 = vmatpush.bf16.msrb.mxu2 %v2328_v59  ;;  %v2428_v55 = vor.u32 %v2761_v50, %v2425_v53  ;;  %v2384_v59 = vor.u32 %v2752_v56, %v2383_v54  ;;  %v617_v53 = vlaneseq }
 0x2d4   :  { %553 = vadd.xlane.f32.xlu1 %v546_v17  ;;  %v545_v18 = vmul.f32 %v3170_v16, %v3170_v16  ;;  %1029 = vmatpush.bf16.msra.mxu0 %v2292_v58  ;;  %v2271_v17 = vld [vmem:[#allocation8 + $0x30] sm:$0xf]  ;;  %v2718_v58 = vld [vmem:[#allocation8 + $0x4] sm:$0xf0] }
 0x2d5   :  { %1011 = vmatpush.bf16.msrb.mxu3 %v2408_v15  ;;  %v2248_v60 = vor.u32 %v2718_v58, %v2247_v57  ;;  %v2751_v58 = vld [vmem:[#allocation8 + $0x114] sm:$0xf] }
 0x2d6   :  { %551 = vadd.xlane.f32.xlu0 %v545_v18  ;;  %v2724_v18 = vld [vmem:[#allocation8 + $0x34] sm:$0xf0] }
 0x2d7   :  { %995 = vmatpush.bf16.msrb.mxu2 %v2320_v11  ;;  %v2272_v20 = vor.u32 %v2724_v18, %v2271_v17  ;;  %v2376_v11 = vor.u32 %v2750_v6, %v2375_v4  ;;  %v2747_v18 = vld [vmem:[#allocation8 + $0xf4] sm:$0xf]  ;;  %v3209_v4 = vshrl.u32 %v617_v53, 7 }
 0x2d8   :  { %1030 = vmatpush.bf16.msra.mxu0 %v2284_v10  ;;  %v2420_v10 = vor.u32 %v2759_v63, %v2417_v3  ;;  %v2844_v3 = vld [vmem:[#allocation10 + $0x22] ss:$0 sm:$0xff] }
 0x2d9   :  { %974 = vmatpush.bf16.msrb.mxu1 %v2272_v20  ;;  %1012 = vmatpush.bf16.msrb.mxu3 %v2400_v8  ;;  %v2369_v20 = vld [vmem:[#allocation8 + $0xf8] sm:$0xf0]  ;;  %v2745_v8 = vld [vmem:[#allocation8 + $0xe4] sm:$0xf]  ;;  %vm654_vm9 = vcmp.lt.s32.totalorder %v3209_v4, 1  ;;  %vm667_vm10 = vcmp.lt.s32.totalorder %v3209_v4, 7 }
 0x2da   :  { %v620_v53 = vadd.s32 16, %v3209_v4 }
 0x2db   :  { %996 = vmatpush.bf16.msrb.mxu2 %v2312_v25  ;;  %v2409_v25 = vld [vmem:[#allocation8 + $0x148] sm:$0xf0] }
 0x2dc   :  { %1031 = vmatpush.bf16.msra.mxu0 %v2276_v24  ;;  %v2372_v24 = vor.u32 %v2747_v18, %v2369_v20  ;;  %v2412_v29 = vor.u32 %v2757_v21, %v2409_v25  ;;  %v622_v21 = vand.u32 15, %v3209_v4 }
 0x2dd   :  { %975 = vmatpush.bf16.msrb.mxu1 %v2264_v32  ;;  %1013 = vmatpush.bf16.msrb.mxu3 %v2392_v42  ;;  %v2364_v32 = vor.u32 %v2745_v8, %v2361_v28  ;;  %v2329_v8 = vld [vmem:[#allocation8 + $0xa8] sm:$0xf0] }
 0x2de   :  { %vm626_vm7 = vcmp.ne.s32.totalorder %v622_v21, 0 }
 0x2df   :  { %1065 = vmatpush.bf16.msra.mxu2 %v2436_v38 }
 0x2e0   :  { %1032 = vmatpush.bf16.msra.mxu0 %v2268_v37  ;;  %v2353_v37 = vld [vmem:[#allocation8 + $0xd8] sm:$0xf0] }
 0x2e1   :  { %976 = vmatpush.bf16.msrb.mxu1 %v2256_v47  ;;  %1014 = vmatpush.bf16.msrb.mxu3 %v2384_v59  ;;  %v2385_v59 = vld [vmem:[#allocation8 + $0x118] sm:$0xf0] }
 0x2e2   :  { %v2388_v6 = vor.u32 %v2751_v58, %v2385_v59  ;;  %v621_v58 = vadd.s32 24, %v3209_v4 }
 0x2e3   :  { %1066 = vmatpush.bf16.msra.mxu2 %v2428_v55 }
 0x2e4   :  { %1033 = vmatpush.bf16.msra.mxu0 %v2260_v52  ;;  %v3199_v52 = vld [vmem:[#allocation10 + $0x21] ss:$0 sm:$0xff] }
 0x2e5   :  { %977 = vmatpush.bf16.msrb.mxu1 %v2248_v60  ;;  %1015 = vmatpush.bf16.msrb.mxu3 %v2376_v11  ;;  %v619_v11 = vadd.s32 8, %v3209_v4 }
 0x2e7   :  { %1067 = vmatpush.bf16.msra.mxu2 %v2420_v10 }
 0x2e8   :  { %1034 = vmatpush.bf16.msra.mxu0 %v2252_v2 }
 0x2e9   :  { %1046 = vmatpush.bf16.msra.mxu1 %v2372_v24 }
 0x2eb   :  { %1068 = vmatpush.bf16.msra.mxu2 %v2412_v29 }
 0x2ed   :  { %1047 = vmatpush.bf16.msra.mxu1 %v2364_v32 }
 0x2ef   :  { %1069 = vmatpush.bf16.msra.mxu2 %v2404_v35  ;;  %v2321_v35 = vld [vmem:[#allocation8 + $0x98] sm:$0xf0] }
 0x33f   :  { %v548_v31 = vpop.xlane.xlu0 %547 }
 0x340   :  { %v555_v36 = vmul.f32 %v548_v31, %v3154_v1 }
 0x341   :  { %v550_v41 = vpop.xlane.xlu2 %549 }
 0x342   :  { %v3177_v43 = vadd.f32 1e-05, %v555_v36  ;;  %v556_v44 = vmul.f32 %v550_v41, %v3154_v1  ;;  %v2743_v36 = vld [vmem:[#allocation8 + $0xd4] sm:$0xf]  ;;  %v2393_v41 = vld [vmem:[#allocation8 + $0x128] sm:$0xf0] }
 0x344   :  { %2862 = vrsqrt.f32 %v3177_v43  ;;  %v3181_v51 = vadd.f32 1e-05, %v556_v44  ;;  %vm569_vm12 = vweird.f32 %v3177_v43  ;;  %v2356_v44 = vor.u32 %v2743_v36, %v2353_v37 }
 0x346   :  { %2864 = vrsqrt.f32 %v3181_v51  ;;  %vm579_vm15 = vweird.f32 %v3181_v51  ;;  %1048 = vmatpush.bf16.msra.mxu1 %v2356_v44 }
 0x347   :  { %v554_v0 = vpop.xlane.xlu1 %553 }
 0x348   :  { %v558_v9 = vmul.f32 %v554_v0, %v3154_v1 }
 0x349   :  { %v552_v12 = vpop.xlane.xlu0 %551 }
 0x34a   :  { %v2863_v13 = vpop.eup %2862  ;;  %v3185_v15 = vadd.f32 1e-05, %v558_v9  ;;  %v557_v17 = vmul.f32 %v552_v12, %v3154_v1  ;;  %1049 = vmatpush.bf16.msra.mxu1 %v2348_v61  ;;  %v2739_v12 = vld [vmem:[#allocation8 + $0xb4] sm:$0xf]  ;;  %v624_v61 = vand.u32 15, %v620_v53 }
 0x34b   :  { %v564_v19 = vmul.f32 %v2863_v13, %v3177_v43  ;;  %vm570_vm11 = vweird.f32 %v2863_v13  ;;  %v2396_v43 = vor.u32 %v2753_v40, %v2393_v41  ;;  %v2733_v40 = vld [vmem:[#allocation8 + $0x84] sm:$0xf]  ;;  %v2313_v41 = vld [vmem:[#allocation8 + $0x88] sm:$0xf0] }
 0x34c   :  { %v2865_v22 = vpop.eup %2864  ;;  %2866 = vrsqrt.f32 %v3185_v15  ;;  %v3190_v23 = vadd.f32 1e-05, %v557_v17  ;;  %vm571_vm14 = vmor %vm569_vm12, %vm570_vm11  ;;  %vm599_vm2 = vweird.f32 %v3185_v15  ;;  %vm628_vm11 = vcmp.ne.s32.totalorder %v624_v61, 0 }
 0x34d   :  { %v565_v26 = vmul.f32 %v2863_v13, %v564_v19  ;;  %v574_v27 = vmul.f32 %v2865_v22, %v3181_v51  ;;  %vm580_vm13 = vweird.f32 %v2865_v22  ;;  %1070 = vmatpush.bf16.msra.mxu2 %v2396_v43 }
 0x34e   :  { %2868 = vrsqrt.f32 %v3190_v23  ;;  %vm581_vm0 = vmor %vm579_vm15, %vm580_vm13  ;;  %vm589_vm5 = vweird.f32 %v3190_v23 }
 0x34f   :  { %v566_v30 = vmul.f32 0.5, %v565_v26  ;;  %v575_v31 = vmul.f32 %v2865_v22, %v574_v27  ;;  %v2737_v27 = vld [vmem:[#allocation8 + $0xa4] sm:$0xf] }
 0x350   :  { %v2332_v32 = vor.u32 %v2737_v27, %v2329_v8 }
 0x351   :  { %v567_v38 = vsub.f32 1.5, %v566_v30  ;;  %v576_v39 = vmul.f32 0.5, %v575_v31  ;;  %1071 = vmatpush.bf16.msra.mxu2 %v2388_v6  ;;  %v623_v30 = vand.u32 15, %v619_v11 }
 0x352   :  { %v3194_v42 = vpop.eup %2866 }
 0x353   :  { %v568_v45 = vmul.f32 %v2863_v13, %v567_v38  ;;  %v577_v46 = vsub.f32 1.5, %v576_v39  ;;  %v594_v47 = vmul.f32 %v3194_v42, %v3185_v15  ;;  %vm600_vm1 = vweird.f32 %v3194_v42  ;;  %v2377_v15 = vld [vmem:[#allocation8 + $0x108] sm:$0xf0] }
 0x354   :  { %v2869_v50 = vpop.eup %2868  ;;  %vm601_vm4 = vmor %vm599_vm2, %vm600_vm1  ;;  %vm639_vm8 = vcmp.ne.s32.totalorder %v623_v30, 15  ;;  %v3089_v38 = vmov 0.0   ;;  %v2846_v30 = vld [vmem:[#allocation10 + $0x24] ss:$0 sm:$0xff] }
 0x355   :  { %v572_v54 = vsel %vm571_vm14, %v2863_v13, %v568_v45  ;;  %v578_v55 = vmul.f32 %v2865_v22, %v577_v46  ;;  %v595_v56 = vmul.f32 %v3194_v42, %v594_v47  ;;  %v584_v57 = vmul.f32 %v2869_v50, %v3190_v23  ;;  %v2337_v13 = vld [vmem:[#allocation8 + $0xb8] sm:$0xf0]  ;;  %v2735_v23 = vld [vmem:[#allocation8 + $0x94] sm:$0xf] }
 0x356   :  { %v603_v60 = vmul.f32 %v572_v54, %v3157_v5  ;;  %vm590_vm3 = vweird.f32 %v2869_v50  ;;  %v2340_v18 = vor.u32 %v2739_v12, %v2337_v13  ;;  %v2324_v37 = vor.u32 %v2735_v23, %v2321_v35 }
 0x357   :  { %v582_v62 = vsel %vm581_vm0, %v2865_v22, %v578_v55  ;;  %v596_v63 = vmul.f32 0.5, %v595_v56  ;;  %v585_v51 = vmul.f32 %v2869_v50, %v584_v57  ;;  %v2749_v22 = vld [vmem:[#allocation8 + $0x104] sm:$0xf]  ;;  %vm591_vm6 = vmor %vm589_vm5, %vm590_vm3  ;;  %v3235_v39 = vsel %vm626_vm7, 1.0, %v3089_v38 }
 0x358   :  { %v608_v0 = vmul.f32 %v3199_v52, %v603_v60  ;;  %v604_v2 = vmul.f32 %v582_v62, %v3160_v7  ;;  %v2380_v26 = vor.u32 %v2749_v22, %v2377_v15  ;;  %1050 = vmatpush.bf16.msra.mxu1 %v2340_v18  ;;  %v3243_v46 = vsel %vm639_vm8, 1.0, %v3089_v38 }
 0x359   :  { %v597_v9 = vsub.f32 1.5, %v596_v63  ;;  %v586_v5 = vmul.f32 0.5, %v585_v51  ;;  %v625_v62 = vand.u32 15, %v621_v58 }
 0x35a   :  { %v609_v10 = vmul.f32 %v3199_v52, %v604_v2  ;;  %v3216_v19 = vadd.f32 %v2844_v3, %v608_v0  ;;  %1072 = vmatpush.bf16.msra.mxu2 %v2380_v26  ;;  %v3265_v2 = vsel %vm628_vm11, 1.0, %v3089_v38 }
 0x35b   :  { %v598_v7 = vmul.f32 %v3194_v42, %v597_v9  ;;  %v587_v17 = vsub.f32 1.5, %v586_v5  ;;  %vm641_vm12 = vcmp.ne.s32.totalorder %v625_v62, 15 }
 0x35c   :  { %v3218_v20 = vadd.f32 %v2844_v3, %v609_v10  ;;  %1051 = vmatpush.bf16.msra.mxu1 %v2332_v32  ;;  %v663_v54 = vrot.slane %v3216_v19, 1  ;;  %v3269_v6 = vsel %vm641_vm12, 1.0, %v3089_v38 }
 0x35d   :  { %v602_v24 = vsel %vm601_vm4, %v3194_v42, %v598_v7  ;;  %v588_v25 = vmul.f32 %v2869_v50, %v587_v17 }
 0x35e   :  { %v606_v28 = vmul.f32 %v602_v24, %v3167_v14  ;;  %v3227_v29 = vpack.c.bf16 %v3218_v20, %v3216_v19  ;;  %v651_v44 = vrot.slane %v3218_v20, 7  ;;  %v664_v48 = vrot.slane %v3218_v20, 1 }
 0x35f   :  { %v592_v31 = vsel %vm591_vm6, %v2869_v50, %v588_v25  ;;  %v2316_v50 = vor.u32 %v2733_v40, %v2313_v41 }
 0x360   :  { %v611_v33 = vmul.f32 %v3199_v52, %v606_v28  ;;  %v605_v34 = vmul.f32 %v592_v31, %v3170_v16  ;;  %997 = vmatmul.bf16.vlgmr.msrb.gmra.mxu2 %v3227_v29  ;;  %v650_v16 = vrot.slane %v3216_v19, 7  ;;  %1052 = vmatpush.bf16.msra.mxu1 %v2324_v37  ;;  %v670_v59 = vsel %vm667_vm10, %v663_v54, %v664_v48 }
 0x362   :  { %v3232_v14 = vadd.f32 %v2844_v3, %v611_v33  ;;  %v610_v36 = vmul.f32 %v3199_v52, %v605_v34  ;;  %v657_v43 = vsel %vm654_vm9, %v650_v16, %v651_v44 }
 0x364   :  { %v3237_v42 = vadd.f32 %v2844_v3, %v610_v36  ;;  %v653_v45 = vrot.slane %v3232_v14, 7  ;;  %1053 = vmatpush.bf16.msra.mxu1 %v2316_v50  ;;  %v666_v0 = vrot.slane %v3232_v14, 1 }
 0x366   :  { %v658_v47 = vsel %vm654_vm9, %v653_v45, %v650_v16  ;;  %v665_v49 = vrot.slane %v3237_v42, 1  ;;  %v680_v63 = vpack.c.bf16 %v3232_v14, %v3237_v42  ;;  %v652_v51 = vrot.slane %v3237_v42, 7 }
 0x367   :  { %v659_v52 = vmul.f32 %v3235_v39, %v658_v47  ;;  %v671_v9 = vsel %vm667_vm10, %v666_v0, %v663_v54 }
 0x368   :  { %v669_v55 = vsel %vm667_vm10, %v664_v48, %v665_v49  ;;  %v656_v3 = vsel %vm654_vm9, %v651_v44, %v652_v51  ;;  %v675_v10 = vmul.f32 %v3269_v6, %v671_v9  ;;  %v655_v11 = vsel %vm654_vm9, %v652_v51, %v653_v45 }
 0x369   :  { %v676_v56 = vpack.c.bf16 %v657_v43, %v659_v52  ;;  %v673_v57 = vmul.f32 %v3243_v46, %v669_v55  ;;  %v661_v5 = vmul.f32 %v3265_v2, %v656_v3  ;;  %v668_v12 = vsel %vm667_vm10, %v665_v49, %v666_v0  ;;  %v3292_v0 = vld [vmem:[#allocation10 + $0x23] ss:$0 sm:$0xff] }
 0x36a   :  { %v681_v7 = vpack.c.bf16 %v675_v10, %v668_v12 }
 0x36b   :  { %978 = vmatmul.bf16.vlgmr.msrb.gmra.mxu1 %v676_v56  ;;  %1035 = vmatmul.bf16.vlgmr.msra.gmra.mxu0 %v676_v56  ;;  %v678_v60 = vpack.c.bf16 %v673_v57, %v670_v59  ;;  %v679_v13 = vpack.c.bf16 %v655_v11, %v661_v5 }
 0x36d   :  { %1016 = vmatmul.bf16.vlgmr.msrb.gmra.mxu3 %v678_v60 }
 0x370   :  { %1002 = vmatmul.bf16.gmra.mxu2 %v680_v63 }
 0x37b   :  { %983 = vmatmul.bf16.gmra.mxu1 %v679_v13  ;;  %1040 = vmatmul.bf16.gmra.mxu0 %v679_v13 }
 0x37d   :  { %1021 = vmatmul.bf16.gmra.mxu3 %v681_v7 }
 0x380   :  { %1073 = vmatmul.bf16.vlgmr.msra.gmra.mxu2 %v678_v60 }
 0x38b   :  { %1054 = vmatmul.bf16.vlgmr.msra.gmra.mxu1 %v3227_v29 }
 0x390   :  { %1078 = vmatmul.bf16.gmra.mxu2 %v681_v7 }
 0x39b   :  { %1059 = vmatmul.bf16.gmra.mxu1 %v680_v63 }
 0x3e3   :  { %v998_v17 = vpop.f32.mrf.mxu2 }
 0x3e8   :  { %v979_v18 = vpop.f32.mrf.mxu1  ;;  %v1036_v27 = vpop.f32.mrf.mxu0 }
 0x3e9   :  { %v999_v60 = vadd.f32 %v998_v17, %v979_v18 }
 0x3eb   :  { %v3280_v21 = vpop.f32.mrf.mxu2 }
 0x3f0   :  { %v3282_v22 = vpop.f32.mrf.mxu1  ;;  %v1038_v32 = vpop.f32.mrf.mxu0 }
 0x3f1   :  { %v1017_v49 = vpop.f32.mrf.mxu3 }
 0x3f2   :  { %v1018_v51 = vadd.f32 %v1017_v49, %v999_v60 }
 0x3f3   :  { %v3284_v15 = vpop.f32.mrf.mxu2 }
 0x3f4   :  { %v1086_v17 = vadd.f32 %v3292_v0, %v1018_v51 }
 0x3f8   :  { %v3286_v24 = vpop.f32.mrf.mxu1  ;;  %v1041_v40 = vpop.f32.mrf.mxu0 }
 0x3f9   :  { %v1019_v9 = vpop.f32.mrf.mxu3 }
 0x3fb   :  { %v3288_v25 = vpop.f32.mrf.mxu2 }
 0x400   :  { %v3290_v26 = vpop.f32.mrf.mxu1  ;;  %v1043_v55 = vpop.f32.mrf.mxu0 }
 0x403   :  { %v1074_v8 = vpop.f32.mrf.mxu2 }
 0x408   :  { %v1055_v28 = vpop.f32.mrf.mxu1 }
 0x409   :  { %v1056_v29 = vadd.f32 %v1055_v28, %v1036_v27 }
 0x40b   :  { %v1075_v31 = vadd.f32 %v1074_v8, %v1056_v29  ;;  %v1076_v34 = vpop.f32.mrf.mxu2 }
 0x40d   :  { %v1092_v33 = vadd.f32 %v2846_v30, %v1075_v31 }
 0x40f   :  { %v2437_v23 = vmul.f32 -1.442695, %v1092_v33 }
 0x410   :  { %v1057_v35 = vpop.f32.mrf.mxu1 }
 0x411   :  { %2870 = vpow2.f32 %v2437_v23  ;;  %v1058_v36 = vadd.f32 %v1057_v35, %v1038_v32 }
 0x413   :  { %v1077_v37 = vadd.f32 %v1076_v34, %v1058_v36  ;;  %v1079_v45 = vpop.f32.mrf.mxu2 }
 0x415   :  { %v1093_v38 = vadd.f32 %v2846_v30, %v1077_v37 }
 0x417   :  { %v2871_v41 = vpop.eup %2870  ;;  %v2438_v16 = vmul.f32 -1.442695, %v1093_v38 }
 0x418   :  { %v1108_v44 = vadd.f32 1.0, %v2871_v41  ;;  %v1060_v47 = vpop.f32.mrf.mxu1 }
 0x419   :  { %2872 = vpow2.f32 %v2438_v16  ;;  %v1061_v48 = vadd.f32 %v1060_v47, %v1041_v40  ;;  %v1022_v40 = vpop.f32.mrf.mxu3 }
 0x41a   :  { %2874 = vrcp.f32 %v1108_v44  ;;  %v1123_v3 = vand.u32 2147483648, %v1108_v44  ;;  %v1121_v11 = vand.u32 2147483647, %v1108_v44  ;;  %vm1117_vm14 = vweird.f32 %v1108_v44 }
 0x41b   :  { %v1080_v50 = vadd.f32 %v1079_v45, %v1061_v48  ;;  %v1081_v61 = vpop.f32.mrf.mxu2 }
 0x41c   :  { %v1124_v8 = vor.u32 1.1754944e-38, %v1123_v3  ;;  %vm1122_vm0 = vcmp.eq.f32.partialorder %v1121_v11, 8.507059e+37 }
 0x41d   :  { %v1094_v52 = vadd.f32 %v2846_v30, %v1080_v50 }
 0x41f   :  { %v2873_v53 = vpop.eup %2872  ;;  %v2439_v43 = vmul.f32 -1.442695, %v1094_v52 }
 0x420   :  { %v2875_v54 = vpop.eup %2874  ;;  %v1109_v56 = vadd.f32 1.0, %v2873_v53  ;;  %v1062_v57 = vpop.f32.mrf.mxu1 }
 0x421   :  { %2876 = vpow2.f32 %v2439_v43  ;;  %v1063_v58 = vadd.f32 %v1062_v57, %v1043_v55  ;;  %v1113_v59 = vmul.f32 %v2875_v54, %v1108_v44  ;;  %vm1118_vm13 = vweird.f32 %v2875_v54 }
 0x422   :  { %2878 = vrcp.f32 %v1109_v56  ;;  %vm1119_vm15 = vmor %vm1117_vm14, %vm1118_vm13  ;;  %v1138_v23 = vand.u32 2147483648, %v1109_v56  ;;  %v1136_v37 = vand.u32 2147483647, %v1109_v56  ;;  %vm1132_vm2 = vweird.f32 %v1109_v56 }
 0x423   :  { %v1082_v62 = vadd.f32 %v1081_v61, %v1063_v58  ;;  %v1114_v63 = vsub.f32 1.0, %v1113_v59  ;;  %v1006_v61 = vadd.f32 %v3288_v25, %v3290_v26 }
 0x424   :  { %vm1137_vm4 = vcmp.eq.f32.partialorder %v1136_v37, 8.507059e+37  ;;  %v2563_v37 = vld [vmem:[#allocation8 + $0x270] sm:$0xf] }
 0x425   :  { %v1095_v5 = vadd.f32 %v2846_v30, %v1082_v62  ;;  %v1115_v10 = vmul.f32 %v2875_v54, %v1114_v63  ;;  %v1001_v30 = vadd.f32 %v3280_v21, %v3282_v22  ;;  %v1139_v22 = vor.u32 1.1754944e-38, %v1138_v23 }
 0x427   :  { %v2877_v12 = vpop.eup %2876  ;;  %v2440_v13 = vmul.f32 -1.442695, %v1095_v5  ;;  %v1116_v7 = vadd.f32 %v2875_v54, %v1115_v10  ;;  %v1020_v34 = vadd.f32 %v1019_v9, %v1001_v30 }
 0x428   :  { %v2879_v27 = vpop.eup %2878  ;;  %v1110_v18 = vadd.f32 1.0, %v2877_v12 }
 0x429   :  { %2880 = vpow2.f32 %v2440_v13  ;;  %v1120_v28 = vsel %vm1119_vm15, %v2875_v54, %v1116_v7  ;;  %v1128_v29 = vmul.f32 %v2879_v27, %v1109_v56  ;;  %vm1133_vm1 = vweird.f32 %v2879_v27 }
 0x42a   :  { %2882 = vrcp.f32 %v1110_v18  ;;  %v1125_v31 = vsel %vm1122_vm0, %v1124_v8, %v1120_v28  ;;  %vm1134_vm3 = vmor %vm1132_vm2, %vm1133_vm1  ;;  %v1087_v44 = vadd.f32 %v3292_v0, %v1020_v34  ;;  %v1153_v53 = vand.u32 2147483648, %v1110_v18 }
 0x42b   :  { %v1172_v32 = vmul.f32 %v1125_v31, %v1086_v17  ;;  %v1129_v33 = vsub.f32 1.0, %v1128_v29  ;;  %v1151_v55 = vand.u32 2147483647, %v1110_v18  ;;  %vm1147_vm6 = vweird.f32 %v1110_v18 }
 0x42c   :  { %v1154_v58 = vor.u32 1.1754944e-38, %v1153_v53  ;;  %v2531_v53 = vld [vmem:[#allocation8 + $0x230] sm:$0xf] }
 0x42d   :  { %v3298_v35 = vadd.f32 %v1172_v32, %v3216_v19  ;;  %v1130_v36 = vmul.f32 %v2879_v27, %v1129_v33  ;;  %v1004_v19 = vadd.f32 %v3284_v15, %v3286_v24  ;;  %v1024_v15 = vpop.f32.mrf.mxu3  ;;  %vm1152_vm8 = vcmp.eq.f32.partialorder %v1151_v55, 8.507059e+37  ;;  %v2619_v55 = vld [vmem:[#allocation8 + $0x2e0] sm:$0xf] }
 0x42e   :  { %v1025_v51 = vadd.f32 %v1024_v15, %v1006_v61  ;;  %v2499_v15 = vld [vmem:[#allocation8 + $0x1f0] sm:$0xf] }
 0x42f   :  { %v2881_v38 = vpop.eup %2880  ;;  %1182 = vadd.xlane.f32.xlu1 %v3298_v35  ;;  %v1131_v41 = vadd.f32 %v2879_v27, %v1130_v36  ;;  %v1023_v52 = vadd.f32 %v1022_v40, %v1004_v19  ;;  %v2790_v19 = vld [vmem:[#allocation8 + $0x244] sm:$0xf0]  ;;  %v2611_v61 = vld [vmem:[#allocation8 + $0x2d0] sm:$0xf] }
 0x430   :  { %v2883_v16 = vpop.eup %2882  ;;  %v1111_v21 = vadd.f32 1.0, %v2881_v38  ;;  %v1089_v13 = vadd.f32 %v3292_v0, %v1025_v51  ;;  %v2796_v38 = vld [vmem:[#allocation8 + $0x274] sm:$0xf0]  ;;  %v2501_v51 = vld [vmem:[#allocation8 + $0x1f8] sm:$0xf0] }
 0x431   :  { %v1135_v45 = vsel %vm1134_vm3, %v2879_v27, %v1131_v41  ;;  %v1143_v47 = vmul.f32 %v2883_v16, %v1110_v18  ;;  %vm1148_vm5 = vweird.f32 %v2883_v16  ;;  %v1088_v59 = vadd.f32 %v3292_v0, %v1023_v52  ;;  %v2555_v41 = vld [vmem:[#allocation8 + $0x260] sm:$0xf] }
 0x432   :  { %2884 = vrcp.f32 %v1111_v21  ;;  %v1140_v48 = vsel %vm1137_vm4, %v1139_v22, %v1135_v45  ;;  %vm1149_vm7 = vmor %vm1147_vm6, %vm1148_vm5  ;;  %v1168_v3 = vand.u32 2147483648, %v1111_v21  ;;  %v1166_v10 = vand.u32 2147483647, %v1111_v21  ;;  %v2547_v22 = vld [vmem:[#allocation8 + $0x250] sm:$0xf] }
 0x433   :  { %v1173_v49 = vmul.f32 %v1140_v48, %v1087_v44  ;;  %v1144_v50 = vsub.f32 1.0, %v1143_v47  ;;  %vm1162_vm12 = vweird.f32 %v1111_v21  ;;  %v2564_v40 = vor.u32 %v2796_v38, %v2563_v37  ;;  %v2792_v44 = vld [vmem:[#allocation8 + $0x254] sm:$0xf0]  ;;  %v2539_v47 = vld [vmem:[#allocation8 + $0x240] sm:$0xf] }
 0x434   :  { %v1169_v12 = vor.u32 1.1754944e-38, %v1168_v3  ;;  %vm1167_vm14 = vcmp.eq.f32.partialorder %v1166_v10, 8.507059e+37  ;;  %v2548_v45 = vor.u32 %v2792_v44, %v2547_v22  ;;  %v2540_v48 = vor.u32 %v2790_v19, %v2539_v47  ;;  %v2784_v10 = vld [vmem:[#allocation8 + $0x214] sm:$0xf0]  ;;  %v2811_v22 = vld [vmem:[#allocation8 + $0x2f4] sm:$0xf] }
 0x435   :  { %v1177_v43 = vadd.f32 %v1173_v49, %v3218_v20  ;;  %v1145_v54 = vmul.f32 %v2883_v16, %v1144_v50  ;;  %1610 = vmatpush.bf16.msrb.mxu0 %v2564_v40  ;;  %v2627_v49 = vld [vmem:[#allocation8 + $0x2f0] sm:$0xf]  ;;  %v2812_v50 = vld [vmem:[#allocation8 + $0x2f4] sm:$0xf0]  ;;  %v2775_v40 = vld [vmem:[#allocation8 + $0x1d4] sm:$0xf] }
 0x436   :  { %v2628_v52 = vor.u32 %v2812_v50, %v2627_v49  ;;  %v2804_v38 = vld [vmem:[#allocation8 + $0x2b4] sm:$0xf0]  ;;  %v2629_v44 = vld [vmem:[#allocation8 + $0x2f8] sm:$0xf0]  ;;  %v2475_v47 = vld [vmem:[#allocation8 + $0x1c0] sm:$0xf] }
 0x437   :  { %1184 = vadd.xlane.f32.xlu0 %v1177_v43  ;;  %v1146_v56 = vadd.f32 %v2883_v16, %v1145_v54  ;;  %v2774_v19 = vld [vmem:[#allocation8 + $0x1c4] sm:$0xf0]  ;;  %v2587_v49 = vld [vmem:[#allocation8 + $0x2a0] sm:$0xf] }
 0x438   :  { %v2885_v57 = vpop.eup %2884  ;;  %1629 = vmatpush.bf16.msrb.mxu1 %v2628_v52  ;;  %v2476_v52 = vor.u32 %v2774_v19, %v2475_v47  ;;  %v2767_v47 = vld [vmem:[#allocation8 + $0x194] sm:$0xf]  ;;  %v2453_v19 = vld [vmem:[#allocation8 + $0x198] sm:$0xf0] }
 0x439   :  { %v1150_v24 = vsel %vm1149_vm7, %v2883_v16, %v1146_v56  ;;  %v1158_v60 = vmul.f32 %v2885_v57, %v1111_v21  ;;  %vm1163_vm11 = vweird.f32 %v2885_v57  ;;  %v2794_v16 = vld [vmem:[#allocation8 + $0x264] sm:$0xf0] }
 0x43a   :  { %v1155_v62 = vsel %vm1152_vm8, %v1154_v58, %v1150_v24  ;;  %vm1164_vm13 = vmor %vm1162_vm12, %vm1163_vm11  ;;  %v2556_v21 = vor.u32 %v2794_v16, %v2555_v41  ;;  %v2810_v56 = vld [vmem:[#allocation8 + $0x2e4] sm:$0xf0]  ;;  %v2523_v58 = vld [vmem:[#allocation8 + $0x220] sm:$0xf] }
 0x43b   :  { %v1174_v20 = vmul.f32 %v1155_v62, %v1088_v59  ;;  %v1159_v63 = vsub.f32 1.0, %v1158_v60  ;;  %v2786_v59 = vld [vmem:[#allocation8 + $0x224] sm:$0xf0]  ;;  %v2780_v24 = vld [vmem:[#allocation8 + $0x1f4] sm:$0xf0] }
 0x43c   :  { %1611 = vmatpush.bf16.msrb.mxu0 %v2556_v21  ;;  %v2524_v60 = vor.u32 %v2786_v59, %v2523_v58  ;;  %v2500_v62 = vor.u32 %v2780_v24, %v2499_v15  ;;  %v2485_v41 = vld [vmem:[#allocation8 + $0x1d8] sm:$0xf0]  ;;  %v2809_v59 = vld [vmem:[#allocation8 + $0x2e4] sm:$0xf]  ;;  %v2621_v15 = vld [vmem:[#allocation8 + $0x2e8] sm:$0xf0] }
 0x43d   :  { %v1178_v9 = vadd.f32 %v1174_v20, %v3237_v42  ;;  %v1160_v5 = vmul.f32 %v2885_v57, %v1159_v63  ;;  %v2808_v20 = vld [vmem:[#allocation8 + $0x2d4] sm:$0xf0]  ;;  %v2779_v63 = vld [vmem:[#allocation8 + $0x1f4] sm:$0xf]  ;;  %v2488_v21 = vor.u32 %v2775_v40, %v2485_v41 }
 0x43e   :  { %v2612_v3 = vor.u32 %v2808_v20, %v2611_v61  ;;  %1591 = vmatpush.bf16.msra.mxu3 %v2500_v62  ;;  %v2772_v61 = vld [vmem:[#allocation8 + $0x1b4] sm:$0xf0]  ;;  %v3346_v62 = vor.u32 %v2809_v59, %v2621_v15  ;;  %v2579_v20 = vld [vmem:[#allocation8 + $0x290] sm:$0xf]  ;;  %v2597_v15 = vld [vmem:[#allocation8 + $0x2b8] sm:$0xf0] }
 0x43f   :  { %1186 = vadd.xlane.f32.xlu1 %v1178_v9  ;;  %v1161_v11 = vadd.f32 %v2885_v57, %v1160_v5  ;;  %v2515_v5 = vld [vmem:[#allocation8 + $0x210] sm:$0xf] }
 0x440   :  { %1612 = vmatpush.bf16.msrb.mxu0 %v2548_v45 }
 0x441   :  { %v1165_v7 = vsel %vm1164_vm13, %v2885_v57, %v1161_v11  ;;  %v2620_v57 = vor.u32 %v2810_v56, %v2619_v55 }
 0x442   :  { %v1170_v25 = vsel %vm1167_vm14, %v1169_v12, %v1165_v7  ;;  %v2491_v12 = vld [vmem:[#allocation8 + $0x1e0] sm:$0xf]  ;;  %v2516_v7 = vor.u32 %v2784_v10, %v2515_v5  ;;  %v2469_v10 = vld [vmem:[#allocation8 + $0x1b8] sm:$0xf0] }
 0x443   :  { %v1175_v26 = vmul.f32 %v1170_v25, %v1089_v13  ;;  %1630 = vmatpush.bf16.msrb.mxu1 %v2620_v57  ;;  %v2778_v13 = vld [vmem:[#allocation8 + $0x1e4] sm:$0xf0]  ;;  %v2603_v25 = vld [vmem:[#allocation8 + $0x2c0] sm:$0xf] }
 0x444   :  { %1613 = vmatpush.bf16.msrb.mxu0 %v2540_v48  ;;  %v3336_v48 = vor.u32 %v2811_v22, %v2629_v44 }
 0x445   :  { %v1179_v27 = vadd.f32 %v1175_v26, %v3232_v14 }
 0x447   :  { %1188 = vadd.xlane.f32.xlu2 %v1179_v27  ;;  %1631 = vmatpush.bf16.msrb.mxu1 %v2612_v3  ;;  %v2771_v3 = vld [vmem:[#allocation8 + $0x1b4] sm:$0xf] }
 0x4a2   :  { %v1183_v17 = vpop.xlane.xlu1 %1182 }
 0x4a3   :  { %v1190_v42 = vmul.f32 %v1183_v17, %v3154_v1  ;;  %v2806_v17 = vld [vmem:[#allocation8 + $0x2c4] sm:$0xf0] }
 0x4a5   :  { %v3313_v18 = vsub.f32 %v3298_v35, %v1190_v42  ;;  %v2777_v42 = vld [vmem:[#allocation8 + $0x1e4] sm:$0xf] }
 0x4a7   :  { %v1198_v8 = vmul.f32 %v3313_v18, %v3313_v18 }
 0x4a9   :  { %1202 = vadd.xlane.f32.xlu2 %v1198_v8  ;;  %v2493_v8 = vld [vmem:[#allocation8 + $0x1e8] sm:$0xf0] }
 0x4aa   :  { %v1185_v28 = vpop.xlane.xlu0 %1184 }
 0x4ab   :  { %v1191_v0 = vmul.f32 %v1185_v28, %v3154_v1  ;;  %v2604_v28 = vor.u32 %v2806_v17, %v2603_v25  ;;  %v2613_v17 = vld [vmem:[#allocation8 + $0x2d8] sm:$0xf0] }
 0x4ad   :  { %v3318_v29 = vsub.f32 %v1177_v43, %v1191_v0  ;;  %v2788_v43 = vld [vmem:[#allocation8 + $0x234] sm:$0xf0]  ;;  %v2496_v0 = vor.u32 %v2777_v42, %v2493_v8  ;;  %1632 = vmatpush.bf16.msrb.mxu1 %v2604_v28  ;;  %v2571_v42 = vld [vmem:[#allocation8 + $0x280] sm:$0xf] }
 0x4ae   :  { %v2532_v54 = vor.u32 %v2788_v43, %v2531_v53  ;;  %v2802_v53 = vld [vmem:[#allocation8 + $0x2a4] sm:$0xf0]  ;;  %v2773_v43 = vld [vmem:[#allocation8 + $0x1c4] sm:$0xf] }
 0x4af   :  { %v1199_v30 = vmul.f32 %v3318_v29, %v3318_v29  ;;  %v2588_v55 = vor.u32 %v2802_v53, %v2587_v49  ;;  %v2456_v49 = vor.u32 %v2767_v47, %v2453_v19  ;;  %v2443_v53 = vld [vmem:[#allocation8 + $0x180] sm:$0xf]  ;;  %v2791_v19 = vld [vmem:[#allocation8 + $0x254] sm:$0xf] }
 0x4b0   :  { %1614 = vmatpush.bf16.msrb.mxu0 %v2532_v54  ;;  %v2477_v54 = vld [vmem:[#allocation8 + $0x1c8] sm:$0xf0] }
 0x4b1   :  { %1204 = vadd.xlane.f32.xlu1 %v1199_v30  ;;  %v2480_v56 = vor.u32 %v2773_v43, %v2477_v54  ;;  %v2766_v43 = vld [vmem:[#allocation8 + $0x184] sm:$0xf0]  ;;  %v2803_v54 = vld [vmem:[#allocation8 + $0x2b4] sm:$0xf] }
 0x4b2   :  { %v1187_v14 = vpop.xlane.xlu1 %1186  ;;  %v2444_v59 = vor.u32 %v2766_v43, %v2443_v53 }
 0x4b3   :  { %v1192_v31 = vmul.f32 %v1187_v14, %v3154_v1  ;;  %v2507_v14 = vld [vmem:[#allocation8 + $0x200] sm:$0xf] }
 0x4b4   :  { %1615 = vmatpush.bf16.msrb.mxu0 %v2524_v60  ;;  %v2467_v60 = vld [vmem:[#allocation8 + $0x1b0] sm:$0xf] }
 0x4b5   :  { %v3323_v32 = vsub.f32 %v1178_v9, %v1192_v31  ;;  %v2504_v9 = vor.u32 %v2779_v63, %v2501_v51  ;;  %v2782_v31 = vld [vmem:[#allocation8 + $0x204] sm:$0xf0]  ;;  %v2468_v63 = vor.u32 %v2772_v61, %v2467_v60  ;;  %v2800_v51 = vld [vmem:[#allocation8 + $0x294] sm:$0xf0]  ;;  %v3380_v61 = vor.u32 %v2803_v54, %v2597_v15  ;;  %v2789_v54 = vld [vmem:[#allocation8 + $0x244] sm:$0xf] }
 0x4b6   :  { %v2580_v5 = vor.u32 %v2800_v51, %v2579_v20  ;;  %v2445_v20 = vld [vmem:[#allocation8 + $0x188] sm:$0xf0] }
 0x4b7   :  { %v1200_v33 = vmul.f32 %v3323_v32, %v3323_v32  ;;  %1648 = vmatpush.bf16.msrb.mxu2 %v2504_v9 }
 0x4b8   :  { %1616 = vmatpush.bf16.msrb.mxu0 %v2516_v7  ;;  %v2807_v7 = vld [vmem:[#allocation8 + $0x2d4] sm:$0xf] }
 0x4b9   :  { %1206 = vadd.xlane.f32.xlu2 %v1200_v33  ;;  %v2483_v33 = vld [vmem:[#allocation8 + $0x1d0] sm:$0xf]  ;;  %v3352_v28 = vor.u32 %v2807_v7, %v2613_v17  ;;  %v2799_v17 = vld [vmem:[#allocation8 + $0x294] sm:$0xf] }
 0x4ba   :  { %v1189_v34 = vpop.xlane.xlu2 %1188 }
 0x4bb   :  { %v1193_v23 = vmul.f32 %v1189_v34, %v3154_v1  ;;  %1649 = vmatpush.bf16.msrb.mxu2 %v2496_v0  ;;  %v2776_v34 = vld [vmem:[#allocation8 + $0x1d4] sm:$0xf0]  ;;  %v2798_v0 = vld [vmem:[#allocation8 + $0x284] sm:$0xf0] }
 0x4bc   :  { %v2484_v37 = vor.u32 %v2776_v34, %v2483_v33  ;;  %v2572_v34 = vor.u32 %v2798_v0, %v2571_v42 }
 0x4bd   :  { %v3328_v35 = vsub.f32 %v1179_v27, %v1193_v23  ;;  %v2492_v27 = vor.u32 %v2778_v13, %v2491_v12  ;;  %v2508_v23 = vor.u32 %v2782_v31, %v2507_v14  ;;  %v2459_v12 = vld [vmem:[#allocation8 + $0x1a0] sm:$0xf]  ;;  %v2770_v13 = vld [vmem:[#allocation8 + $0x1a4] sm:$0xf0]  ;;  %v2769_v14 = vld [vmem:[#allocation8 + $0x1a4] sm:$0xf] }
 0x4be   :  { %v2461_v31 = vld [vmem:[#allocation8 + $0x1a8] sm:$0xf0] }
 0x4bf   :  { %v1201_v36 = vmul.f32 %v3328_v35, %v3328_v35  ;;  %1592 = vmatpush.bf16.msra.mxu3 %v2492_v27  ;;  %1617 = vmatpush.bf16.msrb.mxu0 %v2508_v23  ;;  %v2460_v27 = vor.u32 %v2770_v13, %v2459_v12  ;;  %v2464_v23 = vor.u32 %v2769_v14, %v2461_v31  ;;  %v2581_v14 = vld [vmem:[#allocation8 + $0x298] sm:$0xf0]  ;;  %v3404_v31 = vld [vmem:[#allocation10 + $0x26] ss:$0 sm:$0xff] }
 0x4c0   :  { %1650 = vmatpush.bf16.msrb.mxu2 %v2488_v21  ;;  %v2605_v21 = vld [vmem:[#allocation8 + $0x2c8] sm:$0xf0] }
 0x4c1   :  { %1208 = vadd.xlane.f32.xlu0 %v1201_v36  ;;  %v2595_v36 = vld [vmem:[#allocation8 + $0x2b0] sm:$0xf] }
 0x4c2   :  { %v2596_v16 = vor.u32 %v2804_v38, %v2595_v36  ;;  %v2451_v36 = vld [vmem:[#allocation8 + $0x190] sm:$0xf] }
 0x4c3   :  { %1593 = vmatpush.bf16.msra.mxu3 %v2484_v37  ;;  %1686 = vmatpush.bf16.msra.mxu0 %v3336_v48  ;;  %v2768_v37 = vld [vmem:[#allocation8 + $0x194] sm:$0xf0] }
 0x4c4   :  { %1633 = vmatpush.bf16.msrb.mxu1 %v2596_v16  ;;  %1651 = vmatpush.bf16.msrb.mxu2 %v2480_v56  ;;  %v2452_v41 = vor.u32 %v2768_v37, %v2451_v36  ;;  %v2805_v16 = vld [vmem:[#allocation8 + $0x2c4] sm:$0xf] }
 0x4c7   :  { %1594 = vmatpush.bf16.msra.mxu3 %v2476_v52  ;;  %1687 = vmatpush.bf16.msra.mxu0 %v3346_v62 }
 0x4c8   :  { %1634 = vmatpush.bf16.msrb.mxu1 %v2588_v55 }
 0x4cb   :  { %1595 = vmatpush.bf16.msra.mxu3 %v2468_v63  ;;  %1688 = vmatpush.bf16.msra.mxu0 %v3352_v28  ;;  %v3382_v63 = vld [vmem:[#allocation10 + $0x25] ss:$0 sm:$0xff] }
 0x4cc   :  { %1635 = vmatpush.bf16.msrb.mxu1 %v2580_v5 }
 0x4cf   :  { %1596 = vmatpush.bf16.msra.mxu3 %v2460_v27  ;;  %v2557_v27 = vld [vmem:[#allocation8 + $0x268] sm:$0xf0] }
 0x4d0   :  { %1636 = vmatpush.bf16.msrb.mxu1 %v2572_v34 }
 0x4d3   :  { %1597 = vmatpush.bf16.msra.mxu3 %v2452_v41 }
 0x4d7   :  { %1598 = vmatpush.bf16.msra.mxu3 %v2444_v59 }
 0x51c   :  { %v1203_v11 = vpop.xlane.xlu2 %1202 }
 0x51d   :  { %v1210_v26 = vmul.f32 %v1203_v11, %v3154_v1  ;;  %v2472_v11 = vor.u32 %v2771_v3, %v2469_v10  ;;  %v2801_v10 = vld [vmem:[#allocation8 + $0x2a4] sm:$0xf] }
 0x51f   :  { %v3333_v30 = vadd.f32 1e-05, %v1210_v26  ;;  %1652 = vmatpush.bf16.msrb.mxu2 %v2472_v11  ;;  %v2589_v11 = vld [vmem:[#allocation8 + $0x2a8] sm:$0xf0] }
 0x521   :  { %2886 = vrsqrt.f32 %v3333_v30  ;;  %vm1224_vm0 = vweird.f32 %v3333_v30 }
 0x523   :  { %1653 = vmatpush.bf16.msrb.mxu2 %v2464_v23  ;;  %v3409_v23 = vor.u32 %v2799_v17, %v2581_v14 }
 0x524   :  { %v1205_v45 = vpop.xlane.xlu1 %1204 }
 0x525   :  { %v1211_v50 = vmul.f32 %v1205_v45, %v3154_v1  ;;  %v3363_v45 = vor.u32 %v2805_v16, %v2605_v21 }
 0x527   :  { %v3340_v57 = vpop.eup %2886  ;;  %v3342_v58 = vadd.f32 1e-05, %v1211_v50  ;;  %1689 = vmatpush.bf16.msra.mxu0 %v3363_v45  ;;  %1654 = vmatpush.bf16.msrb.mxu2 %v2456_v49  ;;  %v2549_v49 = vld [vmem:[#allocation8 + $0x258] sm:$0xf0] }
 0x528   :  { %v1219_v24 = vmul.f32 %v3340_v57, %v3333_v30  ;;  %vm1225_vm15 = vweird.f32 %v3340_v57 }
 0x529   :  { %2888 = vrsqrt.f32 %v3342_v58  ;;  %vm3369_vm1 = vmor %vm1224_vm0, %vm1225_vm15  ;;  %vm1234_vm3 = vweird.f32 %v3342_v58 }
 0x52a   :  { %v1220_v9 = vmul.f32 %v3340_v57, %v1219_v24  ;;  %v2765_v24 = vld [vmem:[#allocation8 + $0x184] sm:$0xf] }
 0x52b   :  { %v2448_v3 = vor.u32 %v2765_v24, %v2445_v20  ;;  %1690 = vmatpush.bf16.msra.mxu0 %v3380_v61 }
 0x52c   :  { %v1221_v25 = vmul.f32 0.5, %v1220_v9  ;;  %v1207_v26 = vpop.xlane.xlu2 %1206 }
 0x52d   :  { %v1212_v8 = vmul.f32 %v1207_v26, %v3154_v1  ;;  %1655 = vmatpush.bf16.msrb.mxu2 %v2448_v3  ;;  %v2793_v26 = vld [vmem:[#allocation8 + $0x264] sm:$0xf] }
 0x52e   :  { %v1222_v33 = vsub.f32 1.5, %v1221_v25  ;;  %v2565_v25 = vld [vmem:[#allocation8 + $0x278] sm:$0xf0]  ;;  %v2560_v37 = vor.u32 %v2793_v26, %v2557_v27 }
 0x52f   :  { %v3354_v38 = vpop.eup %2888  ;;  %v3357_v40 = vadd.f32 1e-05, %v1212_v8  ;;  %v2517_v26 = vld [vmem:[#allocation8 + $0x218] sm:$0xf0] }
 0x530   :  { %v1223_v22 = vmul.f32 %v3340_v57, %v1222_v33  ;;  %v1229_v44 = vmul.f32 %v3354_v38, %v3342_v58  ;;  %vm1235_vm2 = vweird.f32 %v3354_v38  ;;  %v3397_v58 = vor.u32 %v2801_v10, %v2589_v11 }
 0x531   :  { %2890 = vrsqrt.f32 %v3357_v40  ;;  %vm3392_vm4 = vmor %vm1234_vm3, %vm1235_vm2  ;;  %2813 = vmatpush.bf16.msra.mxu2 %v3336_v48  ;;  %vm1244_vm6 = vweird.f32 %v3357_v40 }
 0x532   :  { %v1230_v52 = vmul.f32 %v3354_v38, %v1229_v44  ;;  %v1227_v30 = vsel %vm3369_vm1, %v3340_v57, %v1223_v22  ;;  %1691 = vmatpush.bf16.msra.mxu0 %v3397_v58  ;;  %v2573_v22 = vld [vmem:[#allocation8 + $0x288] sm:$0xf0] }
 0x533   :  { %v1258_v57 = vmul.f32 %v1227_v30, %v3313_v18  ;;  %v2795_v18 = vld [vmem:[#allocation8 + $0x274] sm:$0xf]  ;;  %v2541_v30 = vld [vmem:[#allocation8 + $0x248] sm:$0xf0] }
 0x534   :  { %v1231_v55 = vmul.f32 0.5, %v1230_v52  ;;  %v1209_v56 = vpop.xlane.xlu0 %1208  ;;  %v2568_v0 = vor.u32 %v2795_v18, %v2565_v25  ;;  %v2552_v52 = vor.u32 %v2791_v19, %v2549_v49  ;;  %v2783_v25 = vld [vmem:[#allocation8 + $0x214] sm:$0xf] }
 0x535   :  { %v1213_v60 = vmul.f32 %v1209_v56, %v3154_v1  ;;  %v1263_v33 = vmul.f32 %v3382_v63, %v1258_v57  ;;  %2814 = vmatpush.bf16.msra.mxu2 %v3346_v62  ;;  %v2544_v56 = vor.u32 %v2789_v54, %v2541_v30  ;;  %v2525_v57 = vld [vmem:[#allocation8 + $0x228] sm:$0xf0] }
 0x536   :  { %v1232_v51 = vsub.f32 1.5, %v1231_v55  ;;  %1667 = vmatpush.bf16.msrb.mxu3 %v2568_v0  ;;  %1692 = vmatpush.bf16.msra.mxu0 %v3409_v23  ;;  %v2509_v0 = vld [vmem:[#allocation8 + $0x208] sm:$0xf0] }
 0x537   :  { %v2891_v9 = vpop.eup %2890  ;;  %v3386_v5 = vadd.f32 1e-05, %v1213_v60  ;;  %v3414_v16 = vadd.f32 %v3404_v31, %v1263_v33  ;;  %v2533_v60 = vld [vmem:[#allocation8 + $0x238] sm:$0xf0] }
 0x538   :  { %v1233_v12 = vmul.f32 %v3354_v38, %v1232_v51  ;;  %v1239_v7 = vmul.f32 %v2891_v9, %v3357_v40  ;;  %vm1245_vm5 = vweird.f32 %v2891_v9 }
 0x539   :  { %2892 = vrsqrt.f32 %v3386_v5  ;;  %vm1246_vm7 = vmor %vm1244_vm6, %vm1245_vm5  ;;  %2815 = vmatpush.bf16.msra.mxu2 %v3352_v28  ;;  %vm1254_vm11 = vweird.f32 %v3386_v5  ;;  %v1284_v11 = vrot.slane %v3414_v16, 1  ;;  %v1272_v17 = vrot.slane %v3414_v16, 7 }
 0x53a   :  { %v1237_v42 = vsel %vm3392_vm4, %v3354_v38, %v1233_v12  ;;  %v1240_v8 = vmul.f32 %v2891_v9, %v1239_v7  ;;  %1668 = vmatpush.bf16.msrb.mxu3 %v2560_v37 }
 0x53b   :  { %v1259_v34 = vmul.f32 %v1237_v42, %v3318_v29  ;;  %v2797_v29 = vld [vmem:[#allocation8 + $0x284] sm:$0xf] }
 0x53c   :  { %v1241_v36 = vmul.f32 0.5, %v1240_v8  ;;  %v3422_v62 = vor.u32 %v2797_v29, %v2573_v22  ;;  %v2781_v8 = vld [vmem:[#allocation8 + $0x204] sm:$0xf] }
 0x53d   :  { %v1264_v38 = vmul.f32 %v3382_v63, %v1259_v34  ;;  %2816 = vmatpush.bf16.msra.mxu2 %v3363_v45  ;;  %v2512_v34 = vor.u32 %v2781_v8, %v2509_v0 }
 0x53e   :  { %v1242_v41 = vsub.f32 1.5, %v1241_v36  ;;  %1669 = vmatpush.bf16.msrb.mxu3 %v2552_v52  ;;  %1693 = vmatpush.bf16.msra.mxu0 %v3422_v62 }
 0x53f   :  { %v2893_v48 = vpop.eup %2892  ;;  %v3417_v21 = vadd.f32 %v3404_v31, %v1264_v38 }
 0x540   :  { %v1243_v44 = vmul.f32 %v2891_v9, %v1242_v41  ;;  %v1249_v47 = vmul.f32 %v2893_v48, %v3386_v5  ;;  %vm1255_vm8 = vweird.f32 %v2893_v48 }
 0x541   :  { %v3427_v50 = vpack.c.bf16 %v3417_v21, %v3414_v16  ;;  %vm1256_vm12 = vmor %vm1254_vm11, %vm1255_vm8  ;;  %v1285_v20 = vrot.slane %v3417_v21, 1  ;;  %2817 = vmatpush.bf16.msra.mxu2 %v3380_v61  ;;  %v2520_v61 = vor.u32 %v2783_v25, %v2517_v26  ;;  %v1273_v42 = vrot.slane %v3417_v21, 7 }
 0x542   :  { %v1247_v53 = vsel %vm1246_vm7, %v2891_v9, %v1243_v44  ;;  %v1250_v43 = vmul.f32 %v2893_v48, %v1249_v47  ;;  %1670 = vmatpush.bf16.msrb.mxu3 %v2544_v56  ;;  %v2785_v9 = vld [vmem:[#allocation8 + $0x224] sm:$0xf]  ;;  %v2850_v56 = vld [vmem:[#allocation10 + $0x28] ss:$0 sm:$0xff] }
 0x543   :  { %v1260_v40 = vmul.f32 %v1247_v53, %v3323_v32  ;;  %1618 = vmatmul.bf16.vlgmr.msrb.gmra.mxu0 %v3427_v50  ;;  %v2787_v32 = vld [vmem:[#allocation8 + $0x234] sm:$0xf]  ;;  %v2528_v13 = vor.u32 %v2785_v9, %v2525_v57  ;;  %v1290_v7 = vsel %vm667_vm10, %v1284_v11, %v1285_v20  ;;  %v1278_v33 = vsel %vm654_vm9, %v1272_v17, %v1273_v42 }
 0x544   :  { %v1251_v55 = vmul.f32 0.5, %v1250_v43  ;;  %v2536_v3 = vor.u32 %v2787_v32, %v2533_v60 }
 0x545   :  { %v1265_v59 = vmul.f32 %v3382_v63, %v1260_v40  ;;  %2818 = vmatpush.bf16.msra.mxu2 %v3397_v58 }
 0x546   :  { %v1252_v15 = vsub.f32 1.5, %v1251_v55  ;;  %1671 = vmatpush.bf16.msrb.mxu3 %v2536_v3 }
 0x547   :  { %v3436_v24 = vadd.f32 %v3404_v31, %v1265_v59 }
 0x548   :  { %v1253_v28 = vmul.f32 %v2893_v48, %v1252_v15 }
 0x549   :  { %v1286_v51 = vrot.slane %v3436_v24, 1  ;;  %2819 = vmatpush.bf16.msra.mxu2 %v3409_v23 }
 0x54a   :  { %v1257_v10 = vsel %vm1256_vm12, %v2893_v48, %v1253_v28  ;;  %1672 = vmatpush.bf16.msrb.mxu3 %v2528_v13 }
 0x54b   :  { %v1261_v45 = vmul.f32 %v1257_v10, %v3328_v35  ;;  %v1289_v5 = vsel %vm667_vm10, %v1285_v20, %v1286_v51 }
 0x54c   :  { %v1293_v12 = vmul.f32 %v3243_v46, %v1289_v5 }
 0x54d   :  { %v1266_v18 = vmul.f32 %v3382_v63, %v1261_v45  ;;  %2820 = vmatpush.bf16.msra.mxu2 %v3422_v62 }
 0x54e   :  { %v1298_v27 = vpack.c.bf16 %v1293_v12, %v1290_v7  ;;  %1673 = vmatpush.bf16.msrb.mxu3 %v2520_v61 }
 0x54f   :  { %v3452_v35 = vadd.f32 %v3404_v31, %v1266_v18 }
 0x550   :  { %1637 = vmatmul.bf16.vlgmr.msrb.gmra.mxu1 %v1298_v27 }
 0x551   :  { %v1300_v46 = vpack.c.bf16 %v3452_v35, %v3436_v24  ;;  %v1275_v63 = vrot.slane %v3452_v35, 7  ;;  %v1287_v14 = vrot.slane %v3452_v35, 1 }
 0x552   :  { %1674 = vmatpush.bf16.msrb.mxu3 %v2512_v34 }
 0x553   :  { %1623 = vmatmul.bf16.gmra.mxu0 %v1300_v46  ;;  %v1279_v58 = vsel %vm654_vm9, %v1275_v63, %v1272_v17  ;;  %v1291_v23 = vsel %vm667_vm10, %v1287_v14, %v1284_v11  ;;  %v1288_v38 = vsel %vm667_vm10, %v1286_v51, %v1287_v14 }
 0x554   :  { %v1280_v31 = vmul.f32 %v3235_v39, %v1279_v58  ;;  %v1295_v37 = vmul.f32 %v3269_v6, %v1291_v23  ;;  %v1274_v39 = vrot.slane %v3436_v24, 7 }
 0x556   :  { %v1296_v36 = vpack.c.bf16 %v1278_v33, %v1280_v31  ;;  %v1301_v41 = vpack.c.bf16 %v1295_v37, %v1288_v38  ;;  %v1277_v48 = vsel %vm654_vm9, %v1273_v42, %v1274_v39  ;;  %v1276_v29 = vsel %vm654_vm9, %v1274_v39, %v1275_v63  ;;  %v3492_v33 = vld [vmem:[#allocation10 + $0x27] ss:$0 sm:$0xff] }
 0x557   :  { %v1282_v22 = vmul.f32 %v3265_v2, %v1277_v48 }
 0x558   :  { %1599 = vmatmul.bf16.vlgmr.msra.gmra.mxu3 %v1296_v36  ;;  %1656 = vmatmul.bf16.vlgmr.msrb.gmra.mxu2 %v1296_v36 }
 0x559   :  { %v1299_v44 = vpack.c.bf16 %v1276_v29, %v1282_v22 }
 0x560   :  { %1642 = vmatmul.bf16.gmra.mxu1 %v1301_v41 }
 0x563   :  { %1694 = vmatmul.bf16.vlgmr.msra.gmra.mxu0 %v1298_v27 }
 0x568   :  { %1604 = vmatmul.bf16.gmra.mxu3 %v1299_v44  ;;  %1661 = vmatmul.bf16.gmra.mxu2 %v1299_v44 }
 0x578   :  { %1675 = vmatmul.bf16.vlgmr.msrb.gmra.mxu3 %v3427_v50  ;;  %1699 = vmatmul.bf16.vlgmr.msra.gmra.mxu2 %v1301_v41 }
 0x588   :  { %1680 = vmatmul.bf16.gmra.mxu3 %v1300_v46 }
 0x5c0   :  { %v1619_v6 = vpop.f32.mrf.mxu0 }
 0x5c8   :  { %v1621_v19 = vpop.f32.mrf.mxu0 }
 0x5cd   :  { %v1638_v7 = vpop.f32.mrf.mxu1 }
 0x5d0   :  { %v3481_v53 = vpop.f32.mrf.mxu0 }
 0x5d5   :  { %v1640_v38 = vpop.f32.mrf.mxu1 }
 0x5d8   :  { %v3485_v2 = vpop.f32.mrf.mxu0 }
 0x5db   :  { %v1600_v47 = vpop.f32.mrf.mxu3  ;;  %v1657_v49 = vpop.f32.mrf.mxu2 }
 0x5dc   :  { %v1620_v61 = vadd.f32 %v1619_v6, %v1600_v47 }
 0x5de   :  { %v1639_v14 = vadd.f32 %v1638_v7, %v1620_v61 }
 0x5e0   :  { %v1695_v50 = vpop.f32.mrf.mxu0  ;;  %v1707_v44 = vadd.f32 %v3492_v33, %v1639_v14 }
 0x5e3   :  { %v1602_v62 = vpop.f32.mrf.mxu3  ;;  %v1659_v43 = vpop.f32.mrf.mxu2 }
 0x5e4   :  { %v3479_v52 = vadd.f32 %v1621_v19, %v1602_v62 }
 0x5e8   :  { %v1697_v51 = vpop.f32.mrf.mxu0 }
 0x5eb   :  { %v3483_v4 = vpop.f32.mrf.mxu3  ;;  %v1662_v54 = vpop.f32.mrf.mxu2 }
 0x5f3   :  { %v3487_v40 = vpop.f32.mrf.mxu3  ;;  %v1664_v28 = vpop.f32.mrf.mxu2 }
 0x5fb   :  { %v1676_v30 = vpop.f32.mrf.mxu3  ;;  %v1700_v11 = vpop.f32.mrf.mxu2 }
 0x5fc   :  { %v1677_v55 = vadd.f32 %v1676_v30, %v1657_v49 }
 0x5fe   :  { %v1696_v59 = vadd.f32 %v1695_v50, %v1677_v55 }
 0x600   :  { %v1713_v15 = vadd.f32 %v2850_v56, %v1696_v59 }
 0x602   :  { %v2633_v32 = vmul.f32 -1.442695, %v1713_v15 }
 0x603   :  { %v1678_v60 = vpop.f32.mrf.mxu3  ;;  %v1702_v8 = vpop.f32.mrf.mxu2 }
 0x604   :  { %2894 = vpow2.f32 %v2633_v32  ;;  %v1679_v20 = vadd.f32 %v1678_v60, %v1659_v43  ;;  %v1625_v43 = vadd.f32 %v3481_v53, %v3483_v4 }
 0x606   :  { %v1698_v3 = vadd.f32 %v1697_v51, %v1679_v20 }
 0x608   :  { %v1714_v9 = vadd.f32 %v2850_v56, %v1698_v3 }
 0x60a   :  { %v2895_v57 = vpop.eup %2894  ;;  %v2634_v10 = vmul.f32 -1.442695, %v1714_v9  ;;  %v1627_v9 = vadd.f32 %v3485_v2, %v3487_v40 }
 0x60b   :  { %v1729_v45 = vadd.f32 1.0, %v2895_v57  ;;  %v1681_v5 = vpop.f32.mrf.mxu3 }
 0x60c   :  { %2896 = vpow2.f32 %v2634_v10  ;;  %v1682_v12 = vadd.f32 %v1681_v5, %v1662_v54 }
 0x60d   :  { %2898 = vrcp.f32 %v1729_v45  ;;  %v1744_v31 = vand.u32 2147483648, %v1729_v45  ;;  %v1742_v23 = vand.u32 2147483647, %v1729_v45  ;;  %vm1738_vm10 = vweird.f32 %v1729_v45 }
 0x60e   :  { %v1701_v13 = vadd.f32 %v1700_v11, %v1682_v12 }
 0x60f   :  { %v1745_v22 = vor.u32 1.1754944e-38, %v1744_v31  ;;  %vm1743_vm14 = vcmp.eq.f32.partialorder %v1742_v23, 8.507059e+37 }
 0x610   :  { %v1715_v18 = vadd.f32 %v2850_v56, %v1701_v13  ;;  %v1641_v13 = vadd.f32 %v1640_v38, %v3479_v52 }
 0x612   :  { %v2897_v25 = vpop.eup %2896  ;;  %v2635_v26 = vmul.f32 -1.442695, %v1715_v18 }
 0x613   :  { %v2899_v27 = vpop.eup %2898  ;;  %v3489_v46 = vadd.f32 1.0, %v2897_v25  ;;  %v1683_v17 = vpop.f32.mrf.mxu3 }
 0x614   :  { %2900 = vpow2.f32 %v2635_v26  ;;  %v1684_v42 = vadd.f32 %v1683_v17, %v1664_v28  ;;  %v1734_v63 = vmul.f32 %v2899_v27, %v1729_v45  ;;  %vm1739_vm9 = vweird.f32 %v2899_v27 }
 0x615   :  { %2902 = vrcp.f32 %v3489_v46  ;;  %vm1740_vm13 = vmor %vm1738_vm10, %vm1739_vm9  ;;  %v1757_v10 = vand.u32 2147483647, %v3489_v46  ;;  %v1759_v45 = vand.u32 2147483648, %v3489_v46  ;;  %vm1753_vm4 = vweird.f32 %v3489_v46 }
 0x616   :  { %v1703_v0 = vadd.f32 %v1702_v8, %v1684_v42  ;;  %v1735_v58 = vsub.f32 1.0, %v1734_v63 }
 0x617   :  { %vm1758_vm6 = vcmp.eq.f32.partialorder %v1757_v10, 8.507059e+37  ;;  %v1760_v40 = vor.u32 1.1754944e-38, %v1759_v45 }
 0x618   :  { %v1716_v34 = vadd.f32 %v2850_v56, %v1703_v0  ;;  %v1736_v36 = vmul.f32 %v2899_v27, %v1735_v58  ;;  %v1643_v56 = vpop.f32.mrf.mxu1 }
 0x619   :  { %v1644_v15 = vadd.f32 %v1643_v56, %v1625_v43 }
 0x61a   :  { %v2901_v37 = vpop.eup %2900  ;;  %v2636_v39 = vmul.f32 -1.442695, %v1716_v34  ;;  %v1737_v41 = vadd.f32 %v2899_v27, %v1736_v36 }
 0x61b   :  { %v2903_v48 = vpop.eup %2902  ;;  %v1731_v29 = vadd.f32 1.0, %v2901_v37  ;;  %v1709_v51 = vadd.f32 %v3492_v33, %v1644_v15 }
 0x61c   :  { %2904 = vpow2.f32 %v2636_v39  ;;  %v1741_v6 = vsel %vm1740_vm13, %v2899_v27, %v1737_v41  ;;  %v1749_v49 = vmul.f32 %v2903_v48, %v3489_v46  ;;  %vm1754_vm1 = vweird.f32 %v2903_v48 }
 0x61d   :  { %2906 = vrcp.f32 %v1731_v29  ;;  %v1746_v47 = vsel %vm1743_vm14, %v1745_v22, %v1741_v6  ;;  %v1774_v60 = vand.u32 2147483648, %v1731_v29  ;;  %vm1768_vm0 = vweird.f32 %v1731_v29  ;;  %vm1755_vm5 = vmor %vm1753_vm4, %vm1754_vm1 }
 0x61e   :  { %v1793_v19 = vmul.f32 %v1746_v47, %v1707_v44  ;;  %v1750_v50 = vsub.f32 1.0, %v1749_v49  ;;  %v1708_v46 = vadd.f32 %v3492_v33, %v1641_v13 }
 0x61f   :  { %v1775_v57 = vor.u32 1.1754944e-38, %v1774_v60 }
 0x620   :  { %v3497_v62 = vadd.f32 %v1793_v19, %v3414_v16  ;;  %v1751_v32 = vmul.f32 %v2903_v48, %v1750_v50  ;;  %v1772_v16 = vand.u32 2147483647, %v1731_v29  ;;  %v1645_v7 = vpop.f32.mrf.mxu1 }
 0x621   :  { %v1646_v2 = vadd.f32 %v1645_v7, %v1627_v9 }
 0x622   :  { %v2905_v54 = vpop.eup %2904  ;;  %1803 = vadd.xlane.f32.xlu2 %v3497_v62  ;;  %v1752_v53 = vadd.f32 %v2903_v48, %v1751_v32  ;;  %vm1773_vm3 = vcmp.eq.f32.partialorder %v1772_v16, 8.507059e+37 }
 0x623   :  { %v2907_v30 = vpop.eup %2906  ;;  %v1732_v55 = vadd.f32 1.0, %v2905_v54  ;;  %v1710_v0 = vadd.f32 %v3492_v33, %v1646_v2 }
 0x624   :  { %v1764_v59 = vmul.f32 %v2907_v30, %v1731_v29  ;;  %vm1769_vm15 = vweird.f32 %v2907_v30  ;;  %v1756_v25 = vsel %vm1755_vm5, %v2903_v48, %v1752_v53 }
 0x625   :  { %2908 = vrcp.f32 %v1732_v55  ;;  %vm1770_vm2 = vmor %vm1768_vm0, %vm1769_vm15  ;;  %v1789_v27 = vand.u32 2147483648, %v1732_v55  ;;  %v1787_v42 = vand.u32 2147483647, %v1732_v55  ;;  %v1761_v63 = vsel %vm1758_vm6, %v1760_v40, %v1756_v25 }
 0x626   :  { %v1765_v28 = vsub.f32 1.0, %v1764_v59  ;;  %vm1783_vm8 = vweird.f32 %v1732_v55  ;;  %v1794_v58 = vmul.f32 %v1761_v63, %v1708_v46 }
 0x627   :  { %v1790_v52 = vor.u32 1.1754944e-38, %v1789_v27  ;;  %vm1788_vm12 = vcmp.eq.f32.partialorder %v1787_v42, 8.507059e+37 }
 0x628   :  { %v1766_v20 = vmul.f32 %v2907_v30, %v1765_v28 }
 0x62a   :  { %v1767_v3 = vadd.f32 %v2907_v30, %v1766_v20  ;;  %v2851_v20 = vld [vmem:[#allocation10 + $0x29] ss:$0 sm:$0xff] }
 0x62b   :  { %v2909_v4 = vpop.eup %2908 }
 0x62c   :  { %v1771_v11 = vsel %vm1770_vm2, %v2907_v30, %v1767_v3  ;;  %v1779_v5 = vmul.f32 %v2909_v4, %v1732_v55  ;;  %vm1784_vm7 = vweird.f32 %v2909_v4  ;;  %v2852_v3 = vld [vmem:[#allocation10 + $0x2a] ss:$0 sm:$0xff] }
 0x62d   :  { %v1776_v12 = vsel %vm1773_vm3, %v1775_v57, %v1771_v11  ;;  %vm1785_vm11 = vmor %vm1783_vm8, %vm1784_vm7 }
 0x62e   :  { %v1795_v18 = vmul.f32 %v1776_v12, %v1709_v51  ;;  %v1780_v26 = vsub.f32 1.0, %v1779_v5 }
 0x630   :  { %v1799_v61 = vadd.f32 %v1795_v18, %v3436_v24  ;;  %v1781_v17 = vmul.f32 %v2909_v4, %v1780_v26  ;;  %v1798_v24 = vadd.f32 %v1794_v58, %v3417_v21 }
 0x632   :  { %1807 = vadd.xlane.f32.xlu0 %v1799_v61  ;;  %v1782_v8 = vadd.f32 %v2909_v4, %v1781_v17 }
 0x634   :  { %v1786_v14 = vsel %vm1785_vm11, %v2909_v4, %v1782_v8 }
 0x635   :  { %v1791_v31 = vsel %vm1788_vm12, %v1790_v52, %v1786_v14 }
 0x636   :  { %v1796_v34 = vmul.f32 %v1791_v31, %v1710_v0 }
 0x638   :  { %v1800_v36 = vadd.f32 %v1796_v34, %v3452_v35 }
 0x63a   :  { %1805 = vadd.xlane.f32.xlu0 %v1798_v24  ;;  %1809 = vadd.xlane.f32.xlu1 %v1800_v36 }
 0x695   :  { %v1804_v23 = vpop.xlane.xlu2 %1803 }
 0x696   :  { %v1811_v37 = vmul.f32 %v1804_v23, %v3154_v1 }
 0x698   :  { %v1815_v38 = vsub.f32 %v3497_v62, %v1811_v37 }
 0x69a   :  { %v1819_v39 = vmul.f32 %v1815_v38, %v1815_v38 }
 0x69c   :  { %1823 = vadd.xlane.f32.xlu0 %v1819_v39 }
 0x6a5   :  { %v1808_v41 = vpop.xlane.xlu0 %1807 }
 0x6a6   :  { %v1813_v33 = vmul.f32 %v1808_v41, %v3154_v1 }
 0x6a8   :  { %v1817_v48 = vsub.f32 %v1799_v61, %v1813_v33 }
 0x6aa   :  { %v1821_v29 = vmul.f32 %v1817_v48, %v1817_v48 }
 0x6ac   :  { %1827 = vadd.xlane.f32.xlu1 %v1821_v29 }
 0x6ad   :  { %v1806_v22 = vpop.xlane.xlu0 %1805  ;;  %v1810_v44 = vpop.xlane.xlu1 %1809 }
 0x6ae   :  { %v1812_v21 = vmul.f32 %v1806_v22, %v3154_v1  ;;  %v1814_v35 = vmul.f32 %v1810_v44, %v3154_v1 }
 0x6b0   :  { %v3519_v6 = vsub.f32 %v1798_v24, %v1812_v21  ;;  %v3521_v47 = vsub.f32 %v1800_v36, %v1814_v35 }
 0x6b2   :  { %v1820_v19 = vmul.f32 %v3519_v6, %v3519_v6  ;;  %v1822_v49 = vmul.f32 %v3521_v47, %v3521_v47 }
 0x6b4   :  { %1825 = vadd.xlane.f32.xlu1 %v1820_v19  ;;  %1829 = vadd.xlane.f32.xlu2 %v1822_v49 }
 0x70f   :  { %v1824_v62 = vpop.xlane.xlu0 %1823 }
 0x710   :  { %v1831_v43 = vmul.f32 %v1824_v62, %v3154_v1 }
 0x712   :  { %v1835_v54 = vadd.f32 1e-05, %v1831_v43 }
 0x714   :  { %2910 = vrsqrt.f32 %v1835_v54  ;;  %vm1845_vm10 = vweird.f32 %v1835_v54 }
 0x71a   :  { %v2911_v50 = vpop.eup %2910 }
 0x71b   :  { %v1840_v30 = vmul.f32 %v2911_v50, %v1835_v54  ;;  %vm1846_vm9 = vweird.f32 %v2911_v50 }
 0x71c   :  { %vm1847_vm13 = vmor %vm1845_vm10, %vm1846_vm9 }
 0x71d   :  { %v1841_v55 = vmul.f32 %v2911_v50, %v1840_v30 }
 0x71f   :  { %v1842_v56 = vmul.f32 0.5, %v1841_v55  ;;  %v1828_v59 = vpop.xlane.xlu1 %1827 }
 0x720   :  { %v1833_v15 = vmul.f32 %v1828_v59, %v3154_v1  ;;  %v2667_v59 = vld [vmem:[#allocation7 + $0x154] sm:$0xf] }
 0x721   :  { %v1843_v28 = vsub.f32 1.5, %v1842_v56 }
 0x722   :  { %v1837_v32 = vadd.f32 1e-05, %v1833_v15  ;;  %v2684_v15 = vld [vmem:[#allocation7 + $0x168] sm:$0xf0] }
 0x723   :  { %v1844_v60 = vmul.f32 %v2911_v50, %v1843_v28  ;;  %v2668_v28 = vor.u32 %v2684_v15, %v2667_v59 }
 0x724   :  { %2912 = vrsqrt.f32 %v1837_v32  ;;  %vm1865_vm15 = vweird.f32 %v1837_v32 }
 0x725   :  { %v1848_v16 = vsel %vm1847_vm13, %v2911_v50, %v1844_v60  ;;  %2821 = vmatpush.bf16.msra.mxu3 %v2668_v28  ;;  %2037 = vmatpush.bf16.msra.mxu1 %v2668_v28  ;;  %v2683_v60 = vld [vmem:[#allocation7 + $0x138] sm:$0xf0] }
 0x726   :  { %v1879_v51 = vmul.f32 %v1848_v16, %v1815_v38  ;;  %v2659_v16 = vld [vmem:[#allocation7 + $0xf4] sm:$0xf] }
 0x727   :  { %v1830_v53 = vpop.xlane.xlu2 %1829  ;;  %v1826_v4 = vpop.xlane.xlu1 %1825 }
 0x728   :  { %v1834_v9 = vmul.f32 %v1830_v53, %v3154_v1  ;;  %v1832_v57 = vmul.f32 %v1826_v4, %v3154_v1  ;;  %v1884_v10 = vmul.f32 %v2851_v20, %v1879_v51  ;;  %v2682_v51 = vld [vmem:[#allocation7 + $0x108] sm:$0xf0]  ;;  %v2655_v4 = vld [vmem:[#allocation7 + $0xc4] sm:$0xf] }
 0x72a   :  { %v2913_v45 = vpop.eup %2912  ;;  %v1838_v11 = vadd.f32 1e-05, %v1834_v9  ;;  %v1836_v5 = vadd.f32 1e-05, %v1832_v57  ;;  %v1889_v12 = vadd.f32 %v2852_v3, %v1884_v10  ;;  %v2681_v9 = vld [vmem:[#allocation7 + $0xd8] sm:$0xf0] }
 0x72b   :  { %v1860_v13 = vmul.f32 %v2913_v45, %v1837_v32  ;;  %vm1866_vm14 = vweird.f32 %v2913_v45  ;;  %v2663_v32 = vld [vmem:[#allocation7 + $0x124] sm:$0xf]  ;;  %v2656_v10 = vor.u32 %v2681_v9, %v2655_v4 }
 0x72c   :  { %2914 = vrsqrt.f32 %v1838_v11  ;;  %1895 = vadd.xlane.f32.xlu1 %v1889_v12  ;;  %vm1867_vm0 = vmor %vm1865_vm15, %vm1866_vm14  ;;  %vm1875_vm3 = vweird.f32 %v1838_v11  ;;  %vm1855_vm5 = vweird.f32 %v1836_v5 }
 0x72d   :  { %v1861_v7 = vmul.f32 %v2913_v45, %v1860_v13  ;;  %2916 = vrsqrt.f32 %v1836_v5  ;;  %v2647_v13 = vld [vmem:[#allocation7 + $0x64] sm:$0xf] }
 0x72f   :  { %v1862_v18 = vmul.f32 0.5, %v1861_v7  ;;  %v2679_v7 = vld [vmem:[#allocation7 + $0x78] sm:$0xf0] }
 0x731   :  { %v1863_v25 = vsub.f32 1.5, %v1862_v18  ;;  %v2648_v18 = vor.u32 %v2679_v7, %v2647_v13  ;;  %v2855_v13 = vld [vmem:[#allocation10 + $0x2d] ss:$0 sm:$0xff] }
 0x732   :  { %v2915_v26 = vpop.eup %2914 }
 0x733   :  { %v2917_v2 = vpop.eup %2916  ;;  %v1864_v40 = vmul.f32 %v2913_v45, %v1863_v25  ;;  %v1870_v27 = vmul.f32 %v2915_v26, %v1838_v11  ;;  %vm1876_vm1 = vweird.f32 %v2915_v26  ;;  %v2680_v11 = vld [vmem:[#allocation7 + $0xa8] sm:$0xf0]  ;;  %v2643_v25 = vld [vmem:[#allocation7 + $0x34] sm:$0xf] }
 0x734   :  { %v1850_v61 = vmul.f32 %v2917_v2, %v1836_v5  ;;  %vm1856_vm2 = vweird.f32 %v2917_v2  ;;  %vm1877_vm4 = vmor %vm1875_vm3, %vm1876_vm1 }
 0x735   :  { %v1871_v17 = vmul.f32 %v2915_v26, %v1870_v27  ;;  %v1868_v42 = vsel %vm1867_vm0, %v2913_v45, %v1864_v40  ;;  %vm1857_vm6 = vmor %vm1855_vm5, %vm1856_vm2  ;;  %v2651_v45 = vld [vmem:[#allocation7 + $0x94] sm:$0xf]  ;;  %v2639_v27 = vld [vmem:[#allocation7 + $0x4] sm:$0xf] }
 0x736   :  { %v1851_v63 = vmul.f32 %v2917_v2, %v1850_v61  ;;  %v1881_v46 = vmul.f32 %v1868_v42, %v1817_v48  ;;  %v2677_v61 = vld [vmem:[#allocation7 + $0x18] sm:$0xf0] }
 0x737   :  { %v1872_v8 = vmul.f32 0.5, %v1871_v17 }
 0x738   :  { %v1852_v52 = vmul.f32 0.5, %v1851_v63  ;;  %v1886_v0 = vmul.f32 %v2851_v20, %v1881_v46  ;;  %v2640_v63 = vor.u32 %v2677_v61, %v2639_v27 }
 0x739   :  { %v1873_v58 = vsub.f32 1.5, %v1872_v8 }
 0x73a   :  { %v1853_v14 = vsub.f32 1.5, %v1852_v52  ;;  %v1891_v31 = vadd.f32 %v2852_v3, %v1886_v0 }
 0x73b   :  { %v1874_v34 = vmul.f32 %v2915_v26, %v1873_v58 }
 0x73c   :  { %v1854_v24 = vmul.f32 %v2917_v2, %v1853_v14  ;;  %1899 = vadd.xlane.f32.xlu2 %v1891_v31 }
 0x73d   :  { %v1878_v36 = vsel %vm1877_vm4, %v2915_v26, %v1874_v34  ;;  %v2678_v26 = vld [vmem:[#allocation7 + $0x48] sm:$0xf0] }
 0x73e   :  { %v1882_v23 = vmul.f32 %v1878_v36, %v3521_v47  ;;  %v1858_v37 = vsel %vm1857_vm6, %v2917_v2, %v1854_v24  ;;  %v2644_v40 = vor.u32 %v2678_v26, %v2643_v25 }
 0x73f   :  { %v1880_v38 = vmul.f32 %v1858_v37, %v3519_v6 }
 0x740   :  { %v1887_v39 = vmul.f32 %v2851_v20, %v1882_v23 }
 0x741   :  { %v1885_v41 = vmul.f32 %v2851_v20, %v1880_v38  ;;  %v2664_v20 = vor.u32 %v2683_v60, %v2663_v32  ;;  %v2853_v32 = vld [vmem:[#allocation10 + $0x2b] ss:$0 sm:$0xff] }
 0x742   :  { %v1892_v33 = vadd.f32 %v2852_v3, %v1887_v39 }
 0x743   :  { %v1890_v48 = vadd.f32 %v2852_v3, %v1885_v41  ;;  %2822 = vmatpush.bf16.msra.mxu3 %v2664_v20  ;;  %2038 = vmatpush.bf16.msra.mxu1 %v2664_v20  ;;  %v2660_v3 = vor.u32 %v2682_v51, %v2659_v16 }
 0x744   :  { %1901 = vadd.xlane.f32.xlu0 %v1892_v33 }
 0x745   :  { %1897 = vadd.xlane.f32.xlu2 %v1890_v48 }
 0x747   :  { %2823 = vmatpush.bf16.msra.mxu3 %v2660_v3  ;;  %2039 = vmatpush.bf16.msra.mxu1 %v2660_v3 }
 0x74b   :  { %2824 = vmatpush.bf16.msra.mxu3 %v2656_v10  ;;  %2040 = vmatpush.bf16.msra.mxu1 %v2656_v10 }
 0x79f   :  { %v1896_v29 = vpop.xlane.xlu1 %1895 }
 0x7a0   :  { %v1903_v22 = vmul.f32 %v1896_v29, %v3154_v1 }
 0x7a2   :  { %v3534_v44 = vsub.f32 %v1889_v12, %v1903_v22  ;;  %v2652_v12 = vor.u32 %v2680_v11, %v2651_v45 }
 0x7a4   :  { %v1911_v21 = vmul.f32 %v3534_v44, %v3534_v44  ;;  %2825 = vmatpush.bf16.msra.mxu3 %v2652_v12  ;;  %2041 = vmatpush.bf16.msra.mxu1 %v2652_v12 }
 0x7a6   :  { %1915 = vadd.xlane.f32.xlu2 %v1911_v21 }
 0x7a8   :  { %2826 = vmatpush.bf16.msra.mxu3 %v2648_v18  ;;  %2042 = vmatpush.bf16.msra.mxu1 %v2648_v18 }
 0x7ac   :  { %2827 = vmatpush.bf16.msra.mxu3 %v2644_v40  ;;  %2043 = vmatpush.bf16.msra.mxu1 %v2644_v40 }
 0x7af   :  { %v1900_v35 = vpop.xlane.xlu2 %1899 }
 0x7b0   :  { %v1905_v47 = vmul.f32 %v1900_v35, %v3154_v1  ;;  %2828 = vmatpush.bf16.msra.mxu3 %v2640_v63  ;;  %2044 = vmatpush.bf16.msra.mxu1 %v2640_v63 }
 0x7b2   :  { %v3539_v19 = vsub.f32 %v1891_v31, %v1905_v47 }
 0x7b4   :  { %v1913_v6 = vmul.f32 %v3539_v19, %v3539_v19 }
 0x7b6   :  { %1919 = vadd.xlane.f32.xlu0 %v1913_v6 }
 0x7b7   :  { %v1902_v49 = vpop.xlane.xlu0 %1901 }
 0x7b8   :  { %v1906_v62 = vmul.f32 %v1902_v49, %v3154_v1  ;;  %v1898_v43 = vpop.xlane.xlu2 %1897 }
 0x7b9   :  { %v1904_v54 = vmul.f32 %v1898_v43, %v3154_v1 }
 0x7ba   :  { %v3545_v50 = vsub.f32 %v1892_v33, %v1906_v62 }
 0x7bb   :  { %v3547_v30 = vsub.f32 %v1890_v48, %v1904_v54 }
 0x7bc   :  { %v1914_v55 = vmul.f32 %v3545_v50, %v3545_v50 }
 0x7bd   :  { %v1912_v56 = vmul.f32 %v3547_v30, %v3547_v30 }
 0x7be   :  { %1921 = vadd.xlane.f32.xlu1 %v1914_v55 }
 0x7bf   :  { %1917 = vadd.xlane.f32.xlu0 %v1912_v56 }
 0x819   :  { %v1916_v53 = vpop.xlane.xlu2 %1915 }
 0x81a   :  { %v1923_v57 = vmul.f32 %v1916_v53, %v3154_v1 }
 0x81c   :  { %v1927_v5 = vadd.f32 1e-05, %v1923_v57 }
 0x81e   :  { %2918 = vrsqrt.f32 %v1927_v5  ;;  %vm1937_vm12 = vweird.f32 %v1927_v5 }
 0x824   :  { %v2919_v42 = vpop.eup %2918 }
 0x825   :  { %v1932_v8 = vmul.f32 %v2919_v42, %v1927_v5  ;;  %vm1938_vm8 = vweird.f32 %v2919_v42 }
 0x826   :  { %vm1939_vm10 = vmor %vm1937_vm12, %vm1938_vm8 }
 0x827   :  { %v1933_v0 = vmul.f32 %v2919_v42, %v1932_v8 }
 0x829   :  { %v1920_v2 = vpop.xlane.xlu0 %1919  ;;  %v1934_v37 = vmul.f32 0.5, %v1933_v0 }
 0x82a   :  { %v1925_v17 = vmul.f32 %v1920_v2, %v3154_v1 }
 0x82b   :  { %v1935_v41 = vsub.f32 1.5, %v1934_v37 }
 0x82c   :  { %v1929_v46 = vadd.f32 1e-05, %v1925_v17 }
 0x82d   :  { %v1936_v35 = vmul.f32 %v2919_v42, %v1935_v41 }
 0x82e   :  { %2920 = vrsqrt.f32 %v1929_v46  ;;  %vm1957_vm11 = vweird.f32 %v1929_v46 }
 0x82f   :  { %v1940_v43 = vsel %vm1939_vm10, %v2919_v42, %v1936_v35 }
 0x830   :  { %v1971_v15 = vmul.f32 %v1940_v43, %v3534_v44 }
 0x831   :  { %v1922_v52 = vpop.xlane.xlu1 %1921 }
 0x832   :  { %v1918_v58 = vpop.xlane.xlu0 %1917  ;;  %v1926_v14 = vmul.f32 %v1922_v52, %v3154_v1  ;;  %v1976_v4 = vmul.f32 %v2853_v32, %v1971_v15 }
 0x833   :  { %v1924_v31 = vmul.f32 %v1918_v58, %v3154_v1 }
 0x834   :  { %v2921_v34 = vpop.eup %2920  ;;  %v1930_v24 = vadd.f32 1e-05, %v1926_v14 }
 0x835   :  { %v1952_v36 = vmul.f32 %v2921_v34, %v1929_v46  ;;  %v1928_v23 = vadd.f32 1e-05, %v1924_v31  ;;  %vm1958_vm7 = vweird.f32 %v2921_v34 }
 0x836   :  { %2922 = vrsqrt.f32 %v1930_v24  ;;  %vm1959_vm9 = vmor %vm1957_vm11, %vm1958_vm7  ;;  %vm1967_vm15 = vweird.f32 %v1930_v24 }
 0x837   :  { %v1953_v38 = vmul.f32 %v2921_v34, %v1952_v36  ;;  %2924 = vrsqrt.f32 %v1928_v23  ;;  %vm1947_vm0 = vweird.f32 %v1928_v23 }
 0x839   :  { %v1954_v39 = vmul.f32 0.5, %v1953_v38 }
 0x83b   :  { %v1955_v33 = vsub.f32 1.5, %v1954_v39 }
 0x83c   :  { %v2923_v48 = vpop.eup %2922 }
 0x83d   :  { %v2925_v29 = vpop.eup %2924  ;;  %v1956_v22 = vmul.f32 %v2921_v34, %v1955_v33  ;;  %v1962_v21 = vmul.f32 %v2923_v48, %v1930_v24  ;;  %vm1968_vm13 = vweird.f32 %v2923_v48 }
 0x83e   :  { %v1942_v47 = vmul.f32 %v2925_v29, %v1928_v23  ;;  %vm1948_vm14 = vweird.f32 %v2925_v29  ;;  %vm1969_vm1 = vmor %vm1967_vm15, %vm1968_vm13 }
 0x83f   :  { %v1963_v1 = vmul.f32 %v2923_v48, %v1962_v21  ;;  %v1960_v49 = vsel %vm1959_vm9, %v2921_v34, %v1956_v22  ;;  %vm1949_vm2 = vmor %vm1947_vm0, %vm1948_vm14 }
 0x840   :  { %v1943_v6 = vmul.f32 %v2925_v29, %v1942_v47  ;;  %v1973_v56 = vmul.f32 %v1960_v49, %v3539_v19  ;;  %v2854_v19 = vld [vmem:[#allocation10 + $0x2c] ss:$0 sm:$0xff] }
 0x841   :  { %v1964_v62 = vmul.f32 0.5, %v1963_v1  ;;  %v1981_v45 = vadd.f32 %v2854_v19, %v1976_v4 }
 0x842   :  { %v1944_v54 = vmul.f32 0.5, %v1943_v6  ;;  %v1978_v3 = vmul.f32 %v2853_v32, %v1973_v56 }
 0x843   :  { %v1965_v55 = vsub.f32 1.5, %v1964_v62 }
 0x844   :  { %v1945_v59 = vsub.f32 1.5, %v1944_v54  ;;  %v1983_v10 = vadd.f32 %v2854_v19, %v1978_v3 }
 0x845   :  { %v1966_v28 = vmul.f32 %v2923_v48, %v1965_v55 }
 0x846   :  { %v1946_v60 = vmul.f32 %v2925_v29, %v1945_v59 }
 0x847   :  { %v1970_v20 = vsel %vm1969_vm1, %v2923_v48, %v1966_v28 }
 0x848   :  { %v1950_v16 = vsel %vm1949_vm2, %v2925_v29, %v1946_v60  ;;  %v1974_v51 = vmul.f32 %v1970_v20, %v3545_v50 }
 0x849   :  { %v1972_v53 = vmul.f32 %v1950_v16, %v3547_v30 }
 0x84a   :  { %v1979_v9 = vmul.f32 %v2853_v32, %v1974_v51 }
 0x84b   :  { %v1977_v57 = vmul.f32 %v2853_v32, %v1972_v53 }
 0x84c   :  { %v1984_v44 = vadd.f32 %v2854_v19, %v1979_v9 }
 0x84d   :  { %v1982_v11 = vadd.f32 %v2854_v19, %v1977_v57 }
 0x84e   :  { %v1986_v5 = vpack.c.bf16 %v1984_v44, %v1983_v10 }
 0x84f   :  { %v1985_v12 = vpack.c.bf16 %v1982_v11, %v1981_v45 }
 0x850   :  { %2050 = vmatmul.bf16.vlgmr.msra.gmra.mxu3 %v1986_v5 }
 0x851   :  { %2045 = vmatmul.bf16.vlgmr.msra.gmra.mxu1 %v1985_v12 }
 0x8ce   :  { %v2046_v7 = vpop.f32.mrf.mxu1 }
 0x8cf   :  { %v2047_v18 = vadd.f32 %v2855_v13, %v2046_v7 }
 0x8d1   :  { %2056 = vst [vmem:[#allocation11] sm:$0xff] %v2047_v18 }
 0x8d3   :  { %v2051_v50 = vpop.f32.mrf.mxu3 }
 0x8d4   :  { %v2052_v25 = vadd.f32 %v2855_v13, %v2051_v50 }
 0x8d6   :  { %2058 = vst [vmem:[#allocation11 + $0x10] sm:$0xff] %v2052_v25  ;;  %v2048_v30 = vpop.f32.mrf.mxu1 }
 0x8d7   :  { %v2049_v26 = vadd.f32 %v2855_v13, %v2048_v30 }
 0x8d9   :  { %2057 = vst [vmem:[#allocation11 + $0x8] sm:$0xff] %v2049_v26 }
 0x8db   :  { %v2053_v2 = vpop.f32.mrf.mxu3 }
 0x8dc   :  { %v2054_v40 = vadd.f32 %v2855_v13, %v2053_v2 }
 0x8de   :  { %2059 = vst [vmem:[#allocation11 + $0x18] sm:$0xff] %v2054_v40 }
 0x8df   :  { %2072 = dma.vmem_to_hbm [thread:$0]  %s2065_s4, 512, %s2067_s21, [#allocation4], %s3080_s28, %s3080_s28, %s3081_s29  }
 0x8e0   :  { %3076 = dma.done.wait [#allocation4], 512  }
 0x8e1   :  { %3077 = vsyncadd [#allocation4], 4294966784 }
 0x8e2   :  { %2077 = vsyncpa [#allocation3], 1 }
 0x8e3   :  { %2078 = vsyncpa [#allocation6], 1 }
 0x8e4   :  { %2079 = vsyncpa [#allocation9], 1 }
 0x8e5   :  { %2080 = vsyncpa [#allocation4], 1 }

</bundles_post_ra>
